<compile_context>
chip_gen: v5e
topology: v5e:2x2
jax: 0.10.0
libtpu: 0.0.40
codegen_flags: <defaults>
</compile_context>

<pallas_src>
import jax
import jax.numpy as jnp
from jax import lax
from jax.experimental import pallas as pl
from jax.experimental.pallas import tpu as pltpu

SELU_ALPHA = 1.6732632423543772
SELU_SCALE = 1.0507009873554805
BN_EPS = 1e-5


# ----------------------------- Pallas kernel --------------------------------
def _layer(xin, wt_ref, aff_ref, sel_ref, pad_ref, pw_ref):
    """One Conv3x3(pad=1) + BN(eval) + SELU + MaxPool2x2 stage for one image.

    xin:     (H, W*Cin) f32 value, channel minor within lanes.
    wt_ref:  (3, W*Cin, W*Cout) banded (block-Toeplitz) conv weights, one slab
             per kernel row (W-direction padding folded into the band).
    aff_ref: (2, W*Cout)  row0 = scale, row1 = shift (conv bias + BN folded,
             tiled across W).
    sel_ref: (W*Cout, W*Cout) 0/1 matrix; columns [:half] gather even W-groups,
             columns [half:] gather odd W-groups (W-direction pool compaction).
    pad_ref: (H+2, W*Cin) VMEM scratch (H-padded layer input).
    pw_ref:  (H, (W//2)*Cout) VMEM scratch (post W-pool activation).
    returns  (H//2, (W//2)*Cout) f32 value.
    """
    H, WC = xin.shape
    H2 = H // 2

    # H-padded copy of the layer input (W padding lives in the banded weights).
    zero_row = jnp.zeros((1, WC), jnp.float32)
    pad_ref[0:1, :] = zero_row
    pad_ref[H + 1:H + 2, :] = zero_row
    pad_ref[1:H + 1, :] = xin

    # 3x3 conv as 3 banded matmuls (one per kernel row).
    acc = jnp.dot(pad_ref[0:H, :], wt_ref[0],
                  preferred_element_type=jnp.float32)
    acc = acc + jnp.dot(pad_ref[1:H + 1, :], wt_ref[1],
                        preferred_element_type=jnp.float32)
    acc = acc + jnp.dot(pad_ref[2:H + 2, :], wt_ref[2],
                        preferred_element_type=jnp.float32)

    # Folded conv-bias + BatchNorm(eval) affine, then SELU (clamped exp arg).
    y = acc * aff_ref[0:1, :] + aff_ref[1:2, :]
    y = SELU_SCALE * jnp.where(
        y > 0, y, SELU_ALPHA * (jnp.exp(jnp.minimum(y, 0.0)) - 1.0))

    # 2x2 / stride-2 max pool.
    #   W direction: compact even / odd column groups with one 0/1 matmul,
    #   then a lane-aligned max of the two halves.
    p = jnp.dot(y, sel_ref[...], preferred_element_type=jnp.float32)
    half = sel_ref.shape[1] // 2
    pw_ref[...] = jnp.maximum(p[:, :half], p[:, half:])
    #   H direction: stride-2 sublane reads from VMEM scratch.
    top = pw_ref[pl.ds(0, H2, stride=2), :]
    bot = pw_ref[pl.ds(1, H2, stride=2), :]
    return jnp.maximum(top, bot)


def _encoder_kernel(x_ref,
                    wt1, af1, sl1,
                    wt2, af2, sl2,
                    wt3, af3, sl3,
                    o_ref,
                    pad1, pw1, pad2, pw2, pad3, pw3):
    h = _layer(x_ref[...], wt1, af1, sl1, pad1, pw1)
    h = _layer(h, wt2, af2, sl2, pad2, pw2)
    h = _layer(h, wt3, af3, sl3, pad3, pw3)
    o_ref[...] = h.astype(o_ref.dtype)


# ------------------------------- wrapper -------------------------------------
def _prep_layer(weight, bias, gamma, beta, mean, var, Wsp):
    """Build banded conv weights, folded affine, and pool-selection matrix."""
    Cout, Cin = weight.shape[0], weight.shape[1]
    w_k = jnp.transpose(weight, (2, 3, 1, 0)).astype(jnp.float32)  # (a,b,ci,co)

    # Banded (block-Toeplitz) weights: (3, Wsp*Cin, Wsp*Cout)
    #   wt[a, j_in*Cin+ci, j_out*Cout+co] = w[co,ci,a, j_in-j_out+1] if in band.
    jin = jnp.arange(Wsp * Cin) // Cin
    ci = jnp.arange(Wsp * Cin) % Cin
    jout = jnp.arange(Wsp * Cout) // Cout
    co = jnp.arange(Wsp * Cout) % Cout
    b = jin[:, None] - jout[None, :] + 1
    valid = (b >= 0) & (b <= 2)
    bc = jnp.clip(b, 0, 2)
    wt = jnp.where(valid[None], w_k[:, bc, ci[:, None], co[None, :]], 0.0)
    wt = wt.astype(jnp.float32)

    # Conv bias + eval-mode BatchNorm folded into scale/shift, tiled over W.
    scale = (gamma / jnp.sqrt(var + BN_EPS)).astype(jnp.float32)
    shift = (beta + scale * (bias - mean)).astype(jnp.float32)
    aff = jnp.stack([jnp.tile(scale, Wsp), jnp.tile(shift, Wsp)], axis=0)

    # W-pool selection: [even-groups | odd-groups] -> (Wsp*Cout, Wsp*Cout).
    W2 = Wsp // 2
    rows = jnp.arange(Wsp * Cout)
    cols = jnp.arange(W2 * Cout)
    jr, cr = rows // Cout, rows % Cout
    jc, cc = cols // Cout, cols % Cout
    same_c = cr[:, None] == cc[None, :]
    s_even = (jr[:, None] == 2 * jc[None, :]) & same_c
    s_odd = (jr[:, None] == 2 * jc[None, :] + 1) & same_c
    sel = jnp.concatenate([s_even, s_odd], axis=1).astype(jnp.float32)
    return wt, aff, sel


def encoder_forward(x_nchw, params):
    """Encoder forward. NCHW in / NCHW out (PyTorch convention)."""
    N, Cin, H, W = x_nchw.shape
    assert Cin == 3 and H % 8 == 0 and W % 8 == 0, (Cin, H, W)
    c1, c2, c3 = (p[0].shape[0] for p in params)

    # NCHW -> (N, H, W*Cin), channel minor within lanes.
    x = jnp.transpose(x_nchw, (0, 2, 3, 1)).astype(jnp.float32)
    x = x.reshape(N, H, W * Cin)

    ops = []
    in_specs = [pl.BlockSpec((None, H, W * Cin), lambda n: (n, 0, 0))]
    w_sp = W
    for p in params:
        wt, aff, sel = _prep_layer(*p, w_sp)
        ops += [wt, aff, sel]
        in_specs += [
            pl.BlockSpec(wt.shape, lambda n: (0, 0, 0)),
            pl.BlockSpec(aff.shape, lambda n: (0, 0)),
            pl.BlockSpec(sel.shape, lambda n: (0, 0)),
        ]
        w_sp //= 2

    H1, W1 = H, W
    H2, W2 = H // 2, W // 2
    H3, W3 = H // 4, W // 4
    Ho, Wo = H // 8, W // 8

    out = pl.pallas_call(
        _encoder_kernel,
        out_shape=jax.ShapeDtypeStruct((N, Ho, Wo * c3), jnp.float32),
        grid=(N,),
        in_specs=in_specs,
        out_specs=pl.BlockSpec((None, Ho, Wo * c3), lambda n: (n, 0, 0)),
        scratch_shapes=[
            pltpu.VMEM((H1 + 2, W1 * Cin), jnp.float32),      # pad1
            pltpu.VMEM((H1, W2 * c1), jnp.float32),           # pw1
            pltpu.VMEM((H2 + 2, W2 * c1), jnp.float32),       # pad2
            pltpu.VMEM((H2, W3 * c2), jnp.float32),           # pw2
            pltpu.VMEM((H3 + 2, W3 * c2), jnp.float32),       # pad3
            pltpu.VMEM((H3, Wo * c3), jnp.float32),           # pw3
        ],
        compiler_params=pltpu.CompilerParams(
            dimension_semantics=("parallel",)),
    )(x, *ops)

    out = out.reshape(N, Ho, Wo, c3)                          # NHWC
    return jnp.transpose(out, (0, 3, 1, 2))                   # -> NCHW


# ---------------- pure-JAX reference (for correctness check) ----------------
def _ref_layer(x, w, b, gamma, beta, mean, var):
    y = lax.conv_general_dilated(
        x, w, window_strides=(1, 1), padding=((1, 1), (1, 1)),
        dimension_numbers=('NCHW', 'OIHW', 'NCHW'),
        precision=lax.Precision.HIGHEST)
    y = y + b[None, :, None, None]
    inv = gamma / jnp.sqrt(var + BN_EPS)
    y = inv[None, :, None, None] * (y - mean[None, :, None, None]) \
        + beta[None, :, None, None]
    y = jax.nn.selu(y)
    y = lax.reduce_window(y, -jnp.inf, lax.max,
                          (1, 1, 2, 2), (1, 1, 2, 2), 'VALID')
    return y


def ref_encoder(x, params):
    for p in params:
        x = _ref_layer(x, *p)
    return x


# ---------------------------- parameter init --------------------------------
def init_params(key):
    specs = [(3, 8), (8, 16), (16, 32)]
    params = []
    for cin, cout in specs:
        key, kw, kb, kg, kbe, km, kv = jax.random.split(key, 7)
        bound = 1.0 / jnp.sqrt(cin * 9.0)
        w = jax.random.uniform(kw, (cout, cin, 3, 3), jnp.float32, -bound, bound)
        b = jax.random.uniform(kb, (cout,), jnp.float32, -bound, bound)
        gamma = jax.random.uniform(kg, (cout,), jnp.float32, 0.5, 1.5)
        beta = jax.random.uniform(kbe, (cout,), jnp.float32, -0.5, 0.5)
        mean = jax.random.uniform(km, (cout,), jnp.float32, -0.5, 0.5)
        var = jax.random.uniform(kv, (cout,), jnp.float32, 0.5, 1.5)
        params.append((w, b, gamma, beta, mean, var))
    return params


if __name__ == "__main__":
    key = jax.random.PRNGKey(0)
    key, kx = jax.random.split(key)
    # input: (N=2, C=3, H=32, W=32) -> output (2, 32, 4, 4)
    x = jax.random.normal(kx, (2, 3, 32, 32), jnp.float32)
    params = init_params(key)

    out = jax.jit(encoder_forward)(x, params)
    out = jax.block_until_ready(out)

    ref = ref_encoder(x, params)
    assert out.shape == (2, 32, 4, 4), out.shape
    max_err = float(jnp.max(jnp.abs(out - ref)))
    assert jnp.allclose(out, ref, atol=1e-3, rtol=1e-3), max_err

    print("KERNEL_OK")
</pallas_src>

<mosaic_0001>
module attributes {stable_mosaic.version = 11 : i64} {
  func.func @_encoder_kernel(%arg0: i32, %arg1: memref<1x32x96xf32, #tpu.memory_space<vmem>>, %arg2: memref<3x96x256xf32, #tpu.memory_space<vmem>>, %arg3: memref<2x256xf32, #tpu.memory_space<vmem>>, %arg4: memref<256x256xf32, #tpu.memory_space<vmem>>, %arg5: memref<3x128x256xf32, #tpu.memory_space<vmem>>, %arg6: memref<2x256xf32, #tpu.memory_space<vmem>>, %arg7: memref<256x256xf32, #tpu.memory_space<vmem>>, %arg8: memref<3x128x256xf32, #tpu.memory_space<vmem>>, %arg9: memref<2x256xf32, #tpu.memory_space<vmem>>, %arg10: memref<256x256xf32, #tpu.memory_space<vmem>>, %arg11: memref<1x4x128xf32, #tpu.memory_space<vmem>>, %arg12: memref<34x96xf32, #tpu.memory_space<vmem>>, %arg13: memref<32x128xf32, #tpu.memory_space<vmem>>, %arg14: memref<18x128xf32, #tpu.memory_space<vmem>>, %arg15: memref<16x128xf32, #tpu.memory_space<vmem>>, %arg16: memref<10x128xf32, #tpu.memory_space<vmem>>, %arg17: memref<8x128xf32, #tpu.memory_space<vmem>>) attributes {dimension_semantics = [#tpu.dimension_semantics<parallel>], iteration_bounds = array<i64: 2>, scalar_prefetch = 0 : i64, scratch_operands = 6 : i64, tpu.core_type = #tpu.core_type<tc>, window_params = [{transform_indices = @transform_0, window_bounds = array<i64: 1, 32, 96>}, {pipeline_mode = #tpu.pipeline_mode<synchronous>, transform_indices = @transform_1, window_bounds = array<i64: 3, 96, 256>}, {pipeline_mode = #tpu.pipeline_mode<synchronous>, transform_indices = @transform_2, window_bounds = array<i64: 2, 256>}, {pipeline_mode = #tpu.pipeline_mode<synchronous>, transform_indices = @transform_3, window_bounds = array<i64: 256, 256>}, {pipeline_mode = #tpu.pipeline_mode<synchronous>, transform_indices = @transform_4, window_bounds = array<i64: 3, 128, 256>}, {pipeline_mode = #tpu.pipeline_mode<synchronous>, transform_indices = @transform_5, window_bounds = array<i64: 2, 256>}, {pipeline_mode = #tpu.pipeline_mode<synchronous>, transform_indices = @transform_6, window_bounds = array<i64: 256, 256>}, {pipeline_mode = #tpu.pipeline_mode<synchronous>, transform_indices = @transform_7, window_bounds = array<i64: 3, 128, 256>}, {pipeline_mode = #tpu.pipeline_mode<synchronous>, transform_indices = @transform_8, window_bounds = array<i64: 2, 256>}, {pipeline_mode = #tpu.pipeline_mode<synchronous>, transform_indices = @transform_9, window_bounds = array<i64: 256, 256>}, {transform_indices = @transform_10, window_bounds = array<i64: 1, 4, 128>}]} {
    %c0 = arith.constant 0 : index
    %c0_0 = arith.constant 0 : index
    %c0_1 = arith.constant 0 : index
    %0 = vector.load %arg1[%c0, %c0_0, %c0_1] : memref<1x32x96xf32, #tpu.memory_space<vmem>>, vector<1x32x96xf32>
    %1 = vector.shape_cast %0 : vector<1x32x96xf32> to vector<32x96xf32>
    %cst = arith.constant 0.000000e+00 : f32
    %2 = vector.broadcast %cst : f32 to vector<1x96xf32>
    %c0_2 = arith.constant 0 : index
    %c0_3 = arith.constant 0 : index
    %3 = vector.load %arg12[%c0_2, %c0_3] : memref<34x96xf32, #tpu.memory_space<vmem>>, vector<1x96xf32>
    tpu.vector_store %arg12[%c0_2, %c0_3], %2 {strides = array<i32>} : memref<34x96xf32, #tpu.memory_space<vmem>>, vector<1x96xf32>,
    %c33 = arith.constant 33 : index
    %c0_4 = arith.constant 0 : index
    %4 = vector.load %arg12[%c33, %c0_4] : memref<34x96xf32, #tpu.memory_space<vmem>>, vector<1x96xf32>
    tpu.vector_store %arg12[%c33, %c0_4], %2 {strides = array<i32>} : memref<34x96xf32, #tpu.memory_space<vmem>>, vector<1x96xf32>,
    %c1 = arith.constant 1 : index
    %c0_5 = arith.constant 0 : index
    %5 = vector.load %arg12[%c1, %c0_5] : memref<34x96xf32, #tpu.memory_space<vmem>>, vector<32x96xf32>
    tpu.vector_store %arg12[%c1, %c0_5], %1 {strides = array<i32>} : memref<34x96xf32, #tpu.memory_space<vmem>>, vector<32x96xf32>,
    %c0_6 = arith.constant 0 : index
    %c0_7 = arith.constant 0 : index
    %6 = vector.load %arg12[%c0_6, %c0_7] : memref<34x96xf32, #tpu.memory_space<vmem>>, vector<32x96xf32>
    %c0_8 = arith.constant 0 : index
    %c0_9 = arith.constant 0 : index
    %c0_10 = arith.constant 0 : index
    %7 = vector.load %arg2[%c0_8, %c0_9, %c0_10] : memref<3x96x256xf32, #tpu.memory_space<vmem>>, vector<1x96x256xf32>
    %8 = vector.shape_cast %7 : vector<1x96x256xf32> to vector<96x256xf32>
    %cst_11 = arith.constant dense<0.000000e+00> : vector<32x256xf32>
    %9 = tpu.matmul %6, %8, %cst_11 {dimension_numbers = #tpu.dot_dimension_numbers<[1], [0], [0], [1], [0, 0, 1, 1], [], []>} : vector<32x96xf32>, vector<96x256xf32>, vector<32x256xf32> -> vector<32x256xf32>
    %c1_12 = arith.constant 1 : index
    %c0_13 = arith.constant 0 : index
    %10 = vector.load %arg12[%c1_12, %c0_13] : memref<34x96xf32, #tpu.memory_space<vmem>>, vector<32x96xf32>
    %c1_14 = arith.constant 1 : index
    %c0_15 = arith.constant 0 : index
    %c0_16 = arith.constant 0 : index
    %11 = vector.load %arg2[%c1_14, %c0_15, %c0_16] : memref<3x96x256xf32, #tpu.memory_space<vmem>>, vector<1x96x256xf32>
    %12 = vector.shape_cast %11 : vector<1x96x256xf32> to vector<96x256xf32>
    %cst_17 = arith.constant dense<0.000000e+00> : vector<32x256xf32>
    %13 = tpu.matmul %10, %12, %cst_17 {dimension_numbers = #tpu.dot_dimension_numbers<[1], [0], [0], [1], [0, 0, 1, 1], [], []>} : vector<32x96xf32>, vector<96x256xf32>, vector<32x256xf32> -> vector<32x256xf32>
    %14 = arith.addf %9, %13 : vector<32x256xf32>
    %c2 = arith.constant 2 : index
    %c0_18 = arith.constant 0 : index
    %15 = vector.load %arg12[%c2, %c0_18] : memref<34x96xf32, #tpu.memory_space<vmem>>, vector<32x96xf32>
    %c2_19 = arith.constant 2 : index
    %c0_20 = arith.constant 0 : index
    %c0_21 = arith.constant 0 : index
    %16 = vector.load %arg2[%c2_19, %c0_20, %c0_21] : memref<3x96x256xf32, #tpu.memory_space<vmem>>, vector<1x96x256xf32>
    %17 = vector.shape_cast %16 : vector<1x96x256xf32> to vector<96x256xf32>
    %cst_22 = arith.constant dense<0.000000e+00> : vector<32x256xf32>
    %18 = tpu.matmul %15, %17, %cst_22 {dimension_numbers = #tpu.dot_dimension_numbers<[1], [0], [0], [1], [0, 0, 1, 1], [], []>} : vector<32x96xf32>, vector<96x256xf32>, vector<32x256xf32> -> vector<32x256xf32>
    %19 = arith.addf %14, %18 : vector<32x256xf32>
    %c0_23 = arith.constant 0 : index
    %c0_24 = arith.constant 0 : index
    %20 = vector.load %arg3[%c0_23, %c0_24] : memref<2x256xf32, #tpu.memory_space<vmem>>, vector<1x256xf32>
    %21 = vector.broadcast %20 : vector<1x256xf32> to vector<32x256xf32>
    %22 = arith.mulf %19, %21 : vector<32x256xf32>
    %c1_25 = arith.constant 1 : index
    %c0_26 = arith.constant 0 : index
    %23 = vector.load %arg3[%c1_25, %c0_26] : memref<2x256xf32, #tpu.memory_space<vmem>>, vector<1x256xf32>
    %24 = vector.broadcast %23 : vector<1x256xf32> to vector<32x256xf32>
    %25 = arith.addf %22, %24 : vector<32x256xf32>
    %cst_27 = arith.constant 0.000000e+00 : f32
    %26 = vector.broadcast %cst_27 : f32 to vector<32x256xf32>
    %27 = arith.cmpf ogt, %25, %26 : vector<32x256xf32>
    %cst_28 = arith.constant 0.000000e+00 : f32
    %28 = vector.broadcast %cst_28 : f32 to vector<32x256xf32>
    %29 = arith.minimumf %25, %28 : vector<32x256xf32>
    %30 = math.exp %29 : vector<32x256xf32>
    %cst_29 = arith.constant 1.000000e+00 : f32
    %31 = vector.broadcast %cst_29 : f32 to vector<32x256xf32>
    %32 = arith.subf %30, %31 : vector<32x256xf32>
    %cst_30 = arith.constant 1.67326319 : f32
    %33 = vector.broadcast %cst_30 : f32 to vector<32x256xf32>
    %34 = arith.mulf %33, %32 : vector<32x256xf32>
    %35 = arith.select %27, %25, %34 : vector<32x256xi1>, vector<32x256xf32>
    %cst_31 = arith.constant 1.05070102 : f32
    %36 = vector.broadcast %cst_31 : f32 to vector<32x256xf32>
    %37 = arith.mulf %36, %35 : vector<32x256xf32>
    %c0_32 = arith.constant 0 : index
    %c0_33 = arith.constant 0 : index
    %38 = vector.load %arg4[%c0_32, %c0_33] : memref<256x256xf32, #tpu.memory_space<vmem>>, vector<256x256xf32>
    %cst_34 = arith.constant dense<0.000000e+00> : vector<32x256xf32>
    %39 = tpu.matmul %37, %38, %cst_34 {dimension_numbers = #tpu.dot_dimension_numbers<[1], [0], [0], [1], [0, 0, 1, 1], [], []>} : vector<32x256xf32>, vector<256x256xf32>, vector<32x256xf32> -> vector<32x256xf32>
    %40 = vector.extract_strided_slice %39 {offsets = [0, 0], sizes = [32, 128], strides = [1, 1]} : vector<32x256xf32> to vector<32x128xf32>
    %41 = vector.extract_strided_slice %39 {offsets = [0, 128], sizes = [32, 128], strides = [1, 1]} : vector<32x256xf32> to vector<32x128xf32>
    %42 = arith.maximumf %40, %41 : vector<32x128xf32>
    %c0_35 = arith.constant 0 : index
    %c0_36 = arith.constant 0 : index
    %43 = vector.load %arg13[%c0_35, %c0_36] : memref<32x128xf32, #tpu.memory_space<vmem>>, vector<32x128xf32>
    tpu.vector_store %arg13[%c0_35, %c0_36], %42 {strides = array<i32>} : memref<32x128xf32, #tpu.memory_space<vmem>>, vector<32x128xf32>,
    %c0_37 = arith.constant 0 : index
    %c0_38 = arith.constant 0 : index
    %44 = tpu.strided_load %arg13[%c0_37, %c0_38] {strides = array<i32: 2, 1>} : memref<32x128xf32, #tpu.memory_space<vmem>>, vector<16x128xf32>
    %c1_39 = arith.constant 1 : index
    %c0_40 = arith.constant 0 : index
    %45 = tpu.strided_load %arg13[%c1_39, %c0_40] {strides = array<i32: 2, 1>} : memref<32x128xf32, #tpu.memory_space<vmem>>, vector<16x128xf32>
    %46 = arith.maximumf %44, %45 : vector<16x128xf32>
    %cst_41 = arith.constant 0.000000e+00 : f32
    %47 = vector.broadcast %cst_41 : f32 to vector<1x128xf32>
    %c0_42 = arith.constant 0 : index
    %c0_43 = arith.constant 0 : index
    %48 = vector.load %arg14[%c0_42, %c0_43] : memref<18x128xf32, #tpu.memory_space<vmem>>, vector<1x128xf32>
    tpu.vector_store %arg14[%c0_42, %c0_43], %47 {strides = array<i32>} : memref<18x128xf32, #tpu.memory_space<vmem>>, vector<1x128xf32>,
    %c17 = arith.constant 17 : index
    %c0_44 = arith.constant 0 : index
    %49 = vector.load %arg14[%c17, %c0_44] : memref<18x128xf32, #tpu.memory_space<vmem>>, vector<1x128xf32>
    tpu.vector_store %arg14[%c17, %c0_44], %47 {strides = array<i32>} : memref<18x128xf32, #tpu.memory_space<vmem>>, vector<1x128xf32>,
    %c1_45 = arith.constant 1 : index
    %c0_46 = arith.constant 0 : index
    %50 = vector.load %arg14[%c1_45, %c0_46] : memref<18x128xf32, #tpu.memory_space<vmem>>, vector<16x128xf32>
    tpu.vector_store %arg14[%c1_45, %c0_46], %46 {strides = array<i32>} : memref<18x128xf32, #tpu.memory_space<vmem>>, vector<16x128xf32>,
    %c0_47 = arith.constant 0 : index
    %c0_48 = arith.constant 0 : index
    %51 = vector.load %arg14[%c0_47, %c0_48] : memref<18x128xf32, #tpu.memory_space<vmem>>, vector<16x128xf32>
    %c0_49 = arith.constant 0 : index
    %c0_50 = arith.constant 0 : index
    %c0_51 = arith.constant 0 : index
    %52 = vector.load %arg5[%c0_49, %c0_50, %c0_51] : memref<3x128x256xf32, #tpu.memory_space<vmem>>, vector<1x128x256xf32>
    %53 = vector.shape_cast %52 : vector<1x128x256xf32> to vector<128x256xf32>
    %cst_52 = arith.constant dense<0.000000e+00> : vector<16x256xf32>
    %54 = tpu.matmul %51, %53, %cst_52 {dimension_numbers = #tpu.dot_dimension_numbers<[1], [0], [0], [1], [0, 0, 1, 1], [], []>} : vector<16x128xf32>, vector<128x256xf32>, vector<16x256xf32> -> vector<16x256xf32>
    %c1_53 = arith.constant 1 : index
    %c0_54 = arith.constant 0 : index
    %55 = vector.load %arg14[%c1_53, %c0_54] : memref<18x128xf32, #tpu.memory_space<vmem>>, vector<16x128xf32>
    %c1_55 = arith.constant 1 : index
    %c0_56 = arith.constant 0 : index
    %c0_57 = arith.constant 0 : index
    %56 = vector.load %arg5[%c1_55, %c0_56, %c0_57] : memref<3x128x256xf32, #tpu.memory_space<vmem>>, vector<1x128x256xf32>
    %57 = vector.shape_cast %56 : vector<1x128x256xf32> to vector<128x256xf32>
    %cst_58 = arith.constant dense<0.000000e+00> : vector<16x256xf32>
    %58 = tpu.matmul %55, %57, %cst_58 {dimension_numbers = #tpu.dot_dimension_numbers<[1], [0], [0], [1], [0, 0, 1, 1], [], []>} : vector<16x128xf32>, vector<128x256xf32>, vector<16x256xf32> -> vector<16x256xf32>
    %59 = arith.addf %54, %58 : vector<16x256xf32>
    %c2_59 = arith.constant 2 : index
    %c0_60 = arith.constant 0 : index
    %60 = vector.load %arg14[%c2_59, %c0_60] : memref<18x128xf32, #tpu.memory_space<vmem>>, vector<16x128xf32>
    %c2_61 = arith.constant 2 : index
    %c0_62 = arith.constant 0 : index
    %c0_63 = arith.constant 0 : index
    %61 = vector.load %arg5[%c2_61, %c0_62, %c0_63] : memref<3x128x256xf32, #tpu.memory_space<vmem>>, vector<1x128x256xf32>
    %62 = vector.shape_cast %61 : vector<1x128x256xf32> to vector<128x256xf32>
    %cst_64 = arith.constant dense<0.000000e+00> : vector<16x256xf32>
    %63 = tpu.matmul %60, %62, %cst_64 {dimension_numbers = #tpu.dot_dimension_numbers<[1], [0], [0], [1], [0, 0, 1, 1], [], []>} : vector<16x128xf32>, vector<128x256xf32>, vector<16x256xf32> -> vector<16x256xf32>
    %64 = arith.addf %59, %63 : vector<16x256xf32>
    %c0_65 = arith.constant 0 : index
    %c0_66 = arith.constant 0 : index
    %65 = vector.load %arg6[%c0_65, %c0_66] : memref<2x256xf32, #tpu.memory_space<vmem>>, vector<1x256xf32>
    %66 = vector.broadcast %65 : vector<1x256xf32> to vector<16x256xf32>
    %67 = arith.mulf %64, %66 : vector<16x256xf32>
    %c1_67 = arith.constant 1 : index
    %c0_68 = arith.constant 0 : index
    %68 = vector.load %arg6[%c1_67, %c0_68] : memref<2x256xf32, #tpu.memory_space<vmem>>, vector<1x256xf32>
    %69 = vector.broadcast %68 : vector<1x256xf32> to vector<16x256xf32>
    %70 = arith.addf %67, %69 : vector<16x256xf32>
    %cst_69 = arith.constant 0.000000e+00 : f32
    %71 = vector.broadcast %cst_69 : f32 to vector<16x256xf32>
    %72 = arith.cmpf ogt, %70, %71 : vector<16x256xf32>
    %cst_70 = arith.constant 0.000000e+00 : f32
    %73 = vector.broadcast %cst_70 : f32 to vector<16x256xf32>
    %74 = arith.minimumf %70, %73 : vector<16x256xf32>
    %75 = math.exp %74 : vector<16x256xf32>
    %cst_71 = arith.constant 1.000000e+00 : f32
    %76 = vector.broadcast %cst_71 : f32 to vector<16x256xf32>
    %77 = arith.subf %75, %76 : vector<16x256xf32>
    %cst_72 = arith.constant 1.67326319 : f32
    %78 = vector.broadcast %cst_72 : f32 to vector<16x256xf32>
    %79 = arith.mulf %78, %77 : vector<16x256xf32>
    %80 = arith.select %72, %70, %79 : vector<16x256xi1>, vector<16x256xf32>
    %cst_73 = arith.constant 1.05070102 : f32
    %81 = vector.broadcast %cst_73 : f32 to vector<16x256xf32>
    %82 = arith.mulf %81, %80 : vector<16x256xf32>
    %c0_74 = arith.constant 0 : index
    %c0_75 = arith.constant 0 : index
    %83 = vector.load %arg7[%c0_74, %c0_75] : memref<256x256xf32, #tpu.memory_space<vmem>>, vector<256x256xf32>
    %cst_76 = arith.constant dense<0.000000e+00> : vector<16x256xf32>
    %84 = tpu.matmul %82, %83, %cst_76 {dimension_numbers = #tpu.dot_dimension_numbers<[1], [0], [0], [1], [0, 0, 1, 1], [], []>} : vector<16x256xf32>, vector<256x256xf32>, vector<16x256xf32> -> vector<16x256xf32>
    %85 = vector.extract_strided_slice %84 {offsets = [0, 0], sizes = [16, 128], strides = [1, 1]} : vector<16x256xf32> to vector<16x128xf32>
    %86 = vector.extract_strided_slice %84 {offsets = [0, 128], sizes = [16, 128], strides = [1, 1]} : vector<16x256xf32> to vector<16x128xf32>
    %87 = arith.maximumf %85, %86 : vector<16x128xf32>
    %c0_77 = arith.constant 0 : index
    %c0_78 = arith.constant 0 : index
    %88 = vector.load %arg15[%c0_77, %c0_78] : memref<16x128xf32, #tpu.memory_space<vmem>>, vector<16x128xf32>
    tpu.vector_store %arg15[%c0_77, %c0_78], %87 {strides = array<i32>} : memref<16x128xf32, #tpu.memory_space<vmem>>, vector<16x128xf32>,
    %c0_79 = arith.constant 0 : index
    %c0_80 = arith.constant 0 : index
    %89 = tpu.strided_load %arg15[%c0_79, %c0_80] {strides = array<i32: 2, 1>} : memref<16x128xf32, #tpu.memory_space<vmem>>, vector<8x128xf32>
    %c1_81 = arith.constant 1 : index
    %c0_82 = arith.constant 0 : index
    %90 = tpu.strided_load %arg15[%c1_81, %c0_82] {strides = array<i32: 2, 1>} : memref<16x128xf32, #tpu.memory_space<vmem>>, vector<8x128xf32>
    %91 = arith.maximumf %89, %90 : vector<8x128xf32>
    %cst_83 = arith.constant 0.000000e+00 : f32
    %92 = vector.broadcast %cst_83 : f32 to vector<1x128xf32>
    %c0_84 = arith.constant 0 : index
    %c0_85 = arith.constant 0 : index
    %93 = vector.load %arg16[%c0_84, %c0_85] : memref<10x128xf32, #tpu.memory_space<vmem>>, vector<1x128xf32>
    tpu.vector_store %arg16[%c0_84, %c0_85], %92 {strides = array<i32>} : memref<10x128xf32, #tpu.memory_space<vmem>>, vector<1x128xf32>,
    %c9 = arith.constant 9 : index
    %c0_86 = arith.constant 0 : index
    %94 = vector.load %arg16[%c9, %c0_86] : memref<10x128xf32, #tpu.memory_space<vmem>>, vector<1x128xf32>
    tpu.vector_store %arg16[%c9, %c0_86], %92 {strides = array<i32>} : memref<10x128xf32, #tpu.memory_space<vmem>>, vector<1x128xf32>,
    %c1_87 = arith.constant 1 : index
    %c0_88 = arith.constant 0 : index
    %95 = vector.load %arg16[%c1_87, %c0_88] : memref<10x128xf32, #tpu.memory_space<vmem>>, vector<8x128xf32>
    tpu.vector_store %arg16[%c1_87, %c0_88], %91 {strides = array<i32>} : memref<10x128xf32, #tpu.memory_space<vmem>>, vector<8x128xf32>,
    %c0_89 = arith.constant 0 : index
    %c0_90 = arith.constant 0 : index
    %96 = vector.load %arg16[%c0_89, %c0_90] : memref<10x128xf32, #tpu.memory_space<vmem>>, vector<8x128xf32>
    %c0_91 = arith.constant 0 : index
    %c0_92 = arith.constant 0 : index
    %c0_93 = arith.constant 0 : index
    %97 = vector.load %arg8[%c0_91, %c0_92, %c0_93] : memref<3x128x256xf32, #tpu.memory_space<vmem>>, vector<1x128x256xf32>
    %98 = vector.shape_cast %97 : vector<1x128x256xf32> to vector<128x256xf32>
    %cst_94 = arith.constant dense<0.000000e+00> : vector<8x256xf32>
    %99 = tpu.matmul %96, %98, %cst_94 {dimension_numbers = #tpu.dot_dimension_numbers<[1], [0], [0], [1], [0, 0, 1, 1], [], []>} : vector<8x128xf32>, vector<128x256xf32>, vector<8x256xf32> -> vector<8x256xf32>
    %c1_95 = arith.constant 1 : index
    %c0_96 = arith.constant 0 : index
    %100 = vector.load %arg16[%c1_95, %c0_96] : memref<10x128xf32, #tpu.memory_space<vmem>>, vector<8x128xf32>
    %c1_97 = arith.constant 1 : index
    %c0_98 = arith.constant 0 : index
    %c0_99 = arith.constant 0 : index
    %101 = vector.load %arg8[%c1_97, %c0_98, %c0_99] : memref<3x128x256xf32, #tpu.memory_space<vmem>>, vector<1x128x256xf32>
    %102 = vector.shape_cast %101 : vector<1x128x256xf32> to vector<128x256xf32>
    %cst_100 = arith.constant dense<0.000000e+00> : vector<8x256xf32>
    %103 = tpu.matmul %100, %102, %cst_100 {dimension_numbers = #tpu.dot_dimension_numbers<[1], [0], [0], [1], [0, 0, 1, 1], [], []>} : vector<8x128xf32>, vector<128x256xf32>, vector<8x256xf32> -> vector<8x256xf32>
    %104 = arith.addf %99, %103 : vector<8x256xf32>
    %c2_101 = arith.constant 2 : index
    %c0_102 = arith.constant 0 : index
    %105 = vector.load %arg16[%c2_101, %c0_102] : memref<10x128xf32, #tpu.memory_space<vmem>>, vector<8x128xf32>
    %c2_103 = arith.constant 2 : index
    %c0_104 = arith.constant 0 : index
    %c0_105 = arith.constant 0 : index
    %106 = vector.load %arg8[%c2_103, %c0_104, %c0_105] : memref<3x128x256xf32, #tpu.memory_space<vmem>>, vector<1x128x256xf32>
    %107 = vector.shape_cast %106 : vector<1x128x256xf32> to vector<128x256xf32>
    %cst_106 = arith.constant dense<0.000000e+00> : vector<8x256xf32>
    %108 = tpu.matmul %105, %107, %cst_106 {dimension_numbers = #tpu.dot_dimension_numbers<[1], [0], [0], [1], [0, 0, 1, 1], [], []>} : vector<8x128xf32>, vector<128x256xf32>, vector<8x256xf32> -> vector<8x256xf32>
    %109 = arith.addf %104, %108 : vector<8x256xf32>
    %c0_107 = arith.constant 0 : index
    %c0_108 = arith.constant 0 : index
    %110 = vector.load %arg9[%c0_107, %c0_108] : memref<2x256xf32, #tpu.memory_space<vmem>>, vector<1x256xf32>
    %111 = vector.broadcast %110 : vector<1x256xf32> to vector<8x256xf32>
    %112 = arith.mulf %109, %111 : vector<8x256xf32>
    %c1_109 = arith.constant 1 : index
    %c0_110 = arith.constant 0 : index
    %113 = vector.load %arg9[%c1_109, %c0_110] : memref<2x256xf32, #tpu.memory_space<vmem>>, vector<1x256xf32>
    %114 = vector.broadcast %113 : vector<1x256xf32> to vector<8x256xf32>
    %115 = arith.addf %112, %114 : vector<8x256xf32>
    %cst_111 = arith.constant 0.000000e+00 : f32
    %116 = vector.broadcast %cst_111 : f32 to vector<8x256xf32>
    %117 = arith.cmpf ogt, %115, %116 : vector<8x256xf32>
    %cst_112 = arith.constant 0.000000e+00 : f32
    %118 = vector.broadcast %cst_112 : f32 to vector<8x256xf32>
    %119 = arith.minimumf %115, %118 : vector<8x256xf32>
    %120 = math.exp %119 : vector<8x256xf32>
    %cst_113 = arith.constant 1.000000e+00 : f32
    %121 = vector.broadcast %cst_113 : f32 to vector<8x256xf32>
    %122 = arith.subf %120, %121 : vector<8x256xf32>
    %cst_114 = arith.constant 1.67326319 : f32
    %123 = vector.broadcast %cst_114 : f32 to vector<8x256xf32>
    %124 = arith.mulf %123, %122 : vector<8x256xf32>
    %125 = arith.select %117, %115, %124 : vector<8x256xi1>, vector<8x256xf32>
    %cst_115 = arith.constant 1.05070102 : f32
    %126 = vector.broadcast %cst_115 : f32 to vector<8x256xf32>
    %127 = arith.mulf %126, %125 : vector<8x256xf32>
    %c0_116 = arith.constant 0 : index
    %c0_117 = arith.constant 0 : index
    %128 = vector.load %arg10[%c0_116, %c0_117] : memref<256x256xf32, #tpu.memory_space<vmem>>, vector<256x256xf32>
    %cst_118 = arith.constant dense<0.000000e+00> : vector<8x256xf32>
    %129 = tpu.matmul %127, %128, %cst_118 {dimension_numbers = #tpu.dot_dimension_numbers<[1], [0], [0], [1], [0, 0, 1, 1], [], []>} : vector<8x256xf32>, vector<256x256xf32>, vector<8x256xf32> -> vector<8x256xf32>
    %130 = vector.extract_strided_slice %129 {offsets = [0, 0], sizes = [8, 128], strides = [1, 1]} : vector<8x256xf32> to vector<8x128xf32>
    %131 = vector.extract_strided_slice %129 {offsets = [0, 128], sizes = [8, 128], strides = [1, 1]} : vector<8x256xf32> to vector<8x128xf32>
    %132 = arith.maximumf %130, %131 : vector<8x128xf32>
    %c0_119 = arith.constant 0 : index
    %c0_120 = arith.constant 0 : index
    %133 = vector.load %arg17[%c0_119, %c0_120] : memref<8x128xf32, #tpu.memory_space<vmem>>, vector<8x128xf32>
    tpu.vector_store %arg17[%c0_119, %c0_120], %132 {strides = array<i32>} : memref<8x128xf32, #tpu.memory_space<vmem>>, vector<8x128xf32>,
    %c0_121 = arith.constant 0 : index
    %c0_122 = arith.constant 0 : index
    %134 = tpu.strided_load %arg17[%c0_121, %c0_122] {strides = array<i32: 2, 1>} : memref<8x128xf32, #tpu.memory_space<vmem>>, vector<4x128xf32>
    %c1_123 = arith.constant 1 : index
    %c0_124 = arith.constant 0 : index
    %135 = tpu.strided_load %arg17[%c1_123, %c0_124] {strides = array<i32: 2, 1>} : memref<8x128xf32, #tpu.memory_space<vmem>>, vector<4x128xf32>
    %136 = arith.maximumf %134, %135 : vector<4x128xf32>
    %c0_125 = arith.constant 0 : index
    %c0_126 = arith.constant 0 : index
    %c0_127 = arith.constant 0 : index
    %137 = vector.load %arg11[%c0_125, %c0_126, %c0_127] : memref<1x4x128xf32, #tpu.memory_space<vmem>>, vector<1x4x128xf32>
    %138 = vector.shape_cast %137 : vector<1x4x128xf32> to vector<4x128xf32>
    %139 = vector.shape_cast %136 : vector<4x128xf32> to vector<1x4x128xf32>
    tpu.vector_store %arg11[%c0_125, %c0_126, %c0_127], %139 {strides = array<i32>} : memref<1x4x128xf32, #tpu.memory_space<vmem>>, vector<1x4x128xf32>,
    return
  }
  func.func @transform_0(%arg0: i32) -> (i32, i32, i32) {
    %c0_i32 = arith.constant 0 : i32
    %c0_i32_0 = arith.constant 0 : i32
    %c0_i32_1 = arith.constant 0 : i32
    return %arg0, %c0_i32, %c0_i32_0 : i32, i32, i32
  }
  func.func @transform_1(%arg0: i32) -> (i32, i32, i32) {
    %c0_i32 = arith.constant 0 : i32
    %c0_i32_0 = arith.constant 0 : i32
    %c0_i32_1 = arith.constant 0 : i32
    %c0_i32_2 = arith.constant 0 : i32
    return %c0_i32, %c0_i32_0, %c0_i32_1 : i32, i32, i32
  }
  func.func @transform_2(%arg0: i32) -> (i32, i32) {
    %c0_i32 = arith.constant 0 : i32
    %c0_i32_0 = arith.constant 0 : i32
    %c0_i32_1 = arith.constant 0 : i32
    return %c0_i32, %c0_i32_0 : i32, i32
  }
  func.func @transform_3(%arg0: i32) -> (i32, i32) {
    %c0_i32 = arith.constant 0 : i32
    %c0_i32_0 = arith.constant 0 : i32
    %c0_i32_1 = arith.constant 0 : i32
    return %c0_i32, %c0_i32_0 : i32, i32
  }
  func.func @transform_4(%arg0: i32) -> (i32, i32, i32) {
    %c0_i32 = arith.constant 0 : i32
    %c0_i32_0 = arith.constant 0 : i32
    %c0_i32_1 = arith.constant 0 : i32
    %c0_i32_2 = arith.constant 0 : i32
    return %c0_i32, %c0_i32_0, %c0_i32_1 : i32, i32, i32
  }
  func.func @transform_5(%arg0: i32) -> (i32, i32) {
    %c0_i32 = arith.constant 0 : i32
    %c0_i32_0 = arith.constant 0 : i32
    %c0_i32_1 = arith.constant 0 : i32
    return %c0_i32, %c0_i32_0 : i32, i32
  }
  func.func @transform_6(%arg0: i32) -> (i32, i32) {
    %c0_i32 = arith.constant 0 : i32
    %c0_i32_0 = arith.constant 0 : i32
    %c0_i32_1 = arith.constant 0 : i32
    return %c0_i32, %c0_i32_0 : i32, i32
  }
  func.func @transform_7(%arg0: i32) -> (i32, i32, i32) {
    %c0_i32 = arith.constant 0 : i32
    %c0_i32_0 = arith.constant 0 : i32
    %c0_i32_1 = arith.constant 0 : i32
    %c0_i32_2 = arith.constant 0 : i32
    return %c0_i32, %c0_i32_0, %c0_i32_1 : i32, i32, i32
  }
  func.func @transform_8(%arg0: i32) -> (i32, i32) {
    %c0_i32 = arith.constant 0 : i32
    %c0_i32_0 = arith.constant 0 : i32
    %c0_i32_1 = arith.constant 0 : i32
    return %c0_i32, %c0_i32_0 : i32, i32
  }
  func.func @transform_9(%arg0: i32) -> (i32, i32) {
    %c0_i32 = arith.constant 0 : i32
    %c0_i32_0 = arith.constant 0 : i32
    %c0_i32_1 = arith.constant 0 : i32
    return %c0_i32, %c0_i32_0 : i32, i32
  }
  func.func @transform_10(%arg0: i32) -> (i32, i32, i32) {
    %c0_i32 = arith.constant 0 : i32
    %c0_i32_0 = arith.constant 0 : i32
    %c0_i32_1 = arith.constant 0 : i32
    return %arg0, %c0_i32, %c0_i32_0 : i32, i32, i32
  }
}

</mosaic_0001>

<bundles_post_ra>
// kernel: tile.33
= control target key start
LH: loop header
LB: loop body
LE: loop exit
PB: predicated region body
PF: predicated region fallthrough
CT: control target
= control target key end

     0   :  { %s40_s0 = inlined_call_operand.vmem [shape: f32[8], index: 0, kind: input, shape index: {}]   ;;  %s41_s1 = inlined_call_operand.vmem [shape: f32[32,8], index: 1, kind: output, shape index: {}]  }
   0x1   :  { %v4_v0 = vld [vmem:[%s40_s0] ss:$0 sm:$0xff] }
   0x2   :  { %5 = vst [vmem:[%s41_s1] sm:$0xff] %v4_v0 }
   0x3   :  { %12 = vst [vmem:[%s41_s1 + $0x8] sm:$0xff] %v4_v0 }
   0x4   :  { %13 = vst [vmem:[%s41_s1 + $0x10] sm:$0xff] %v4_v0 }
   0x5   :  { %14 = vst [vmem:[%s41_s1 + $0x18] sm:$0xff] %v4_v0 }

// kernel: tile.38
= control target key start
LH: loop header
LB: loop body
LE: loop exit
PB: predicated region body
PF: predicated region fallthrough
CT: control target
= control target key end

     0   :  { %s7_s6 = smov 3  ;;  %s21_s9 = smov 3  ;;  %vm4_vm0 = vcmask 64512   ;;  %vm11_vm1 = vcmask 1048512   ;;  %vm18_vm2 = vcmask 982912   ;;  %vm25_vm3 = vcmask 917312   ;;  %s233_s0 = inlined_call_operand.vmem [shape: f32[32,8], index: 0, kind: input, shape index: {}]   ;;  %s234_s1 = inlined_call_operand.vmem [shape: f32[1,256], index: 1, kind: output, shape index: {}]  }
   0x1   :  { %v123_v0 = vld [vmem:[%s233_s0 + $0xf] ss:$16 sm:%s7_s6]   ;;  %s154_s10 = smov 120   ;;  %v125_v1 = vld [vmem:[%s233_s0 + $0xd] ss:$16 sm:%s21_s9]   ;;  %s155_s13 = smov 104  }
   0x2   :  { %9 = vrot.lane.b32.xlu0 %v123_v0, %s154_s10  ;;  %23 = vrot.lane.b32.xlu1 %v125_v1, %s155_s13  ;;  %s14_s14 = smov 3  ;;  %s28_s15 = smov 3  ;;  %vm32_vm4 = vcmask 851712   ;;  %vm39_vm5 = vcmask 786112   ;;  %vm46_vm6 = vcmask 720512   ;;  %vm53_vm7 = vcmask 654912  }
   0x3   :  { %v124_v2 = vld [vmem:[%s233_s0 + $0xe] ss:$16 sm:%s14_s14]   ;;  %v126_v3 = vld [vmem:[%s233_s0 + $0xc] ss:$16 sm:%s28_s15]   ;;  %s35_s20 = smov 3  ;;  %s156_s23 = smov 112  }
   0x4   :  { %v127_v4 = vld [vmem:[%s233_s0 + $0xb] ss:$16 sm:%s35_s20]   ;;  %s157_s24 = smov 88   ;;  %s158_s25 = smov 96   ;;  %vm60_vm8 = vcmask 589312   ;;  %vm67_vm9 = vcmask 523712  }
   0x5   :  { %37 = vrot.lane.b32.xlu2 %v127_v4, %s157_s24  ;;  %s49_s26 = smov 3  ;;  %s42_s27 = smov 3  ;;  %vm74_vm10 = vcmask 458112   ;;  %vm81_vm11 = vcmask 392512   ;;  %vm88_vm12 = vcmask 326912   ;;  %vm95_vm13 = vcmask 261312  }
   0x6   :  { %s56_s28 = smov 3  ;;  %v129_v5 = vld [vmem:[%s233_s0 + $0x9] ss:$16 sm:%s49_s26]   ;;  %v128_v6 = vld [vmem:[%s233_s0 + $0xa] ss:$16 sm:%s42_s27]   ;;  %s159_s6 = smov 72  }
   0x7   :  { %v130_v7 = vld [vmem:[%s233_s0 + $0x8] ss:$16 sm:%s56_s28]   ;;  %s160_s7 = smov 80   ;;  %s161_s8 = smov 64   ;;  %vm102_vm14 = vcmask 195712   ;;  %vm109_vm15 = vcmask 130112  }
   0x8   :  { %s70_s9 = smov 3  ;;  %s63_s10 = smov 3 }
   0x9   :  { %s77_s11 = smov 3  ;;  %v132_v8 = vld [vmem:[%s233_s0 + $0x6] ss:$16 sm:%s70_s9]   ;;  %v131_v9 = vld [vmem:[%s233_s0 + $0x7] ss:$16 sm:%s63_s10]   ;;  %s162_s18 = smov 48  }
   0xa   :  { %16 = vrot.lane.b32.xlu0 %v124_v2, %s156_s23  ;;  %30 = vrot.lane.b32.xlu1 %v126_v3, %s158_s25  ;;  %v133_v10 = vld [vmem:[%s233_s0 + $0x5] ss:$16 sm:%s77_s11]   ;;  %s163_s19 = smov 56   ;;  %s164_s20 = smov 40  }
   0xb   :  { %s91_s21 = smov 3  ;;  %s84_s22 = smov 3 }
   0xc   :  { %s98_s23 = smov 3  ;;  %v135_v11 = vld [vmem:[%s233_s0 + $0x3] ss:$16 sm:%s91_s21]   ;;  %v134_v12 = vld [vmem:[%s233_s0 + $0x4] ss:$16 sm:%s84_s22]   ;;  %s165_s30 = smov 24  }
   0xd   :  { %44 = vrot.lane.b32.xlu2 %v128_v6, %s160_s7  ;;  %v136_v13 = vld [vmem:[%s233_s0 + $0x2] ss:$16 sm:%s98_s23]   ;;  %s166_s2 = smov 32   ;;  %s167_s3 = smov 16  }
   0xe   :  { %s105_s4 = smov 3  ;;  %s168_s7 = smov 8  }
   0xf   :  { %v137_v14 = vld [vmem:[%s233_s0 + $0x1] ss:$16 sm:%s105_s4]  }
  0x12   :  { %51 = vrot.lane.b32.xlu0 %v129_v5, %s159_s6  ;;  %58 = vrot.lane.b32.xlu1 %v130_v7, %s161_s8  ;;  %s2_s8 = smov 3 }
  0x13   :  { %v3_v15 = vld [vmem:[%s233_s0] ss:$16 sm:%s2_s8]  }
  0x14   :  { %5 = vst.msk [vmem:[#allocation0] ss:$8 sm:$0x3] %vm4_vm0, %v3_v15  }
  0x15   :  { %65 = vrot.lane.b32.xlu2 %v131_v9, %s163_s19 }
  0x1a   :  { %72 = vrot.lane.b32.xlu0 %v132_v8, %s162_s18  ;;  %79 = vrot.lane.b32.xlu1 %v133_v10, %s164_s20 }
  0x1d   :  { %86 = vrot.lane.b32.xlu2 %v134_v12, %s166_s2 }
  0x22   :  { %93 = vrot.lane.b32.xlu0 %v135_v11, %s165_s30  ;;  %100 = vrot.lane.b32.xlu1 %v136_v13, %s167_s3 }
  0x25   :  { %107 = vrot.lane.b32.xlu2 %v137_v14, %s168_s7 }
  0x5f   :  { %v38_v16 = vpop.permute.xlu2 %37  }
  0x67   :  { %v45_v17 = vpop.permute.xlu2 %44  }
  0x6f   :  { %v66_v19 = vpop.permute.xlu2 %65  }
  0x74   :  { %v10_v18 = vpop.permute.xlu0 %9   ;;  %v24_v20 = vpop.permute.xlu1 %23  }
  0x75   :  { %12 = vst.msk [vmem:[#allocation0] ss:$8 sm:$0x3] %vm11_vm1, %v10_v18  }
  0x77   :  { %v87_v22 = vpop.permute.xlu2 %86  }
  0x7c   :  { %v17_v21 = vpop.permute.xlu0 %16   ;;  %v31_v23 = vpop.permute.xlu1 %30  }
  0x7d   :  { %19 = vst.msk [vmem:[#allocation0] ss:$8 sm:$0x3] %vm18_vm2, %v17_v21  }
  0x7e   :  { %26 = vst.msk [vmem:[#allocation0] ss:$8 sm:$0x3] %vm25_vm3, %v24_v20  }
  0x7f   :  { %33 = vst.msk [vmem:[#allocation0] ss:$8 sm:$0x3] %vm32_vm4, %v31_v23   ;;  %v108_v25 = vpop.permute.xlu2 %107  }
  0x80   :  { %40 = vst.msk [vmem:[#allocation0] ss:$8 sm:$0x3] %vm39_vm5, %v38_v16  }
  0x81   :  { %47 = vst.msk [vmem:[#allocation0] ss:$8 sm:$0x3] %vm46_vm6, %v45_v17  }
  0x84   :  { %v52_v24 = vpop.permute.xlu0 %51   ;;  %v59_v26 = vpop.permute.xlu1 %58  }
  0x85   :  { %54 = vst.msk [vmem:[#allocation0] ss:$8 sm:$0x3] %vm53_vm7, %v52_v24  }
  0x86   :  { %61 = vst.msk [vmem:[#allocation0] ss:$8 sm:$0x3] %vm60_vm8, %v59_v26  }
  0x87   :  { %68 = vst.msk [vmem:[#allocation0] ss:$8 sm:$0x3] %vm67_vm9, %v66_v19  }
  0x8c   :  { %v73_v27 = vpop.permute.xlu0 %72   ;;  %v80_v28 = vpop.permute.xlu1 %79  }
  0x8d   :  { %75 = vst.msk [vmem:[#allocation0] ss:$8 sm:$0x3] %vm74_vm10, %v73_v27  }
  0x8e   :  { %82 = vst.msk [vmem:[#allocation0] ss:$8 sm:$0x3] %vm81_vm11, %v80_v28  }
  0x8f   :  { %89 = vst.msk [vmem:[#allocation0] ss:$8 sm:$0x3] %vm88_vm12, %v87_v22  }
  0x94   :  { %v94_v29 = vpop.permute.xlu0 %93   ;;  %v101_v30 = vpop.permute.xlu1 %100  }
  0x95   :  { %96 = vst.msk [vmem:[#allocation0] ss:$8 sm:$0x3] %vm95_vm13, %v94_v29  }
  0x96   :  { %103 = vst.msk [vmem:[#allocation0] ss:$8 sm:$0x3] %vm102_vm14, %v101_v30  }
  0x97   :  { %110 = vst.msk [vmem:[#allocation0] ss:$8 sm:$0x3] %vm109_vm15, %v108_v25  }
  0x9e   :  { %v113_v31 = vld [vmem:[#allocation0] sm:$0x1]  ;;  %v118_v32 = vld [vmem:[#allocation0 + $0x8] sm:$0x1] }
  0x9f   :  { %116 = vst [vmem:[%s234_s1] sm:$0x1] %v113_v31 }
  0xa0   :  { %138 = vst [vmem:[%s234_s1 + $0x1] sm:$0x1] %v118_v32 }

// kernel: tile.43
= control target key start
LH: loop header
LB: loop body
LE: loop exit
PB: predicated region body
PF: predicated region fallthrough
CT: control target
= control target key end

     0   :  { %s28_s0 = inlined_call_operand.vmem [shape: f32[16], index: 0, kind: input, shape index: {}]   ;;  %s29_s1 = inlined_call_operand.vmem [shape: f32[16,16], index: 1, kind: output, shape index: {}]  }
   0x1   :  { %v4_v0 = vld [vmem:[%s28_s0] ss:$0 sm:$0xff] }
   0x2   :  { %5 = vst [vmem:[%s29_s1] sm:$0xff] %v4_v0 }
   0x3   :  { %8 = vst [vmem:[%s29_s1 + $0x8] sm:$0xff] %v4_v0 }

// kernel: tile.48
= control target key start
LH: loop header
LB: loop body
LE: loop exit
PB: predicated region body
PF: predicated region fallthrough
CT: control target
= control target key end

     0   :  { %s7_s6 = smov 3  ;;  %s21_s9 = smov 3  ;;  %vm4_vm0 = vcmask 130048   ;;  %vm11_vm1 = vcmask 1048448   ;;  %vm18_vm2 = vcmask 917248   ;;  %vm25_vm3 = vcmask 786048   ;;  %s129_s0 = inlined_call_operand.vmem [shape: f32[16,16], index: 0, kind: input, shape index: {}]   ;;  %s130_s1 = inlined_call_operand.vmem [shape: f32[1,256], index: 1, kind: output, shape index: {}]  }
   0x1   :  { %v67_v0 = vld [vmem:[%s129_s0 + $0x7] ss:$8 sm:%s7_s6]   ;;  %s82_s10 = smov 112   ;;  %v69_v1 = vld [vmem:[%s129_s0 + $0x5] ss:$8 sm:%s21_s9]   ;;  %s83_s13 = smov 80  }
   0x2   :  { %9 = vrot.lane.b32.xlu0 %v67_v0, %s82_s10  ;;  %23 = vrot.lane.b32.xlu1 %v69_v1, %s83_s13  ;;  %s14_s14 = smov 3  ;;  %s28_s15 = smov 3  ;;  %vm32_vm4 = vcmask 654848   ;;  %vm39_vm5 = vcmask 523648   ;;  %vm46_vm6 = vcmask 392448   ;;  %vm53_vm7 = vcmask 261248  }
   0x3   :  { %s35_s16 = smov 3  ;;  %v68_v3 = vld [vmem:[%s129_s0 + $0x6] ss:$8 sm:%s14_s14]   ;;  %s84_s21 = smov 48   ;;  %v70_v4 = vld [vmem:[%s129_s0 + $0x4] ss:$8 sm:%s28_s15]  }
   0x4   :  { %v71_v2 = vld [vmem:[%s129_s0 + $0x3] ss:$8 sm:%s35_s16]   ;;  %s42_s24 = smov 3  ;;  %s85_s25 = smov 96  }
   0x5   :  { %37 = vrot.lane.b32.xlu2 %v71_v2, %s84_s21  ;;  %s86_s26 = smov 64   ;;  %s49_s27 = smov 3  ;;  %v72_v5 = vld [vmem:[%s129_s0 + $0x2] ss:$8 sm:%s42_s24]  }
   0x6   :  { %v73_v6 = vld [vmem:[%s129_s0 + $0x1] ss:$8 sm:%s49_s27]   ;;  %s87_s3 = smov 32   ;;  %s88_s4 = smov 16  }
   0x7   :  { %s2_s5 = smov 3 }
   0x8   :  { %v3_v7 = vld [vmem:[%s129_s0] ss:$8 sm:%s2_s5]  }
   0x9   :  { %5 = vst.msk [vmem:[#allocation0] ss:$8 sm:$0x3] %vm4_vm0, %v3_v7  }
   0xa   :  { %16 = vrot.lane.b32.xlu0 %v68_v3, %s85_s25  ;;  %30 = vrot.lane.b32.xlu1 %v70_v4, %s86_s26 }
   0xd   :  { %44 = vrot.lane.b32.xlu2 %v72_v5, %s87_s3 }
  0x12   :  { %51 = vrot.lane.b32.xlu0 %v73_v6, %s88_s4 }
  0x5f   :  { %v38_v8 = vpop.permute.xlu2 %37  }
  0x67   :  { %v45_v9 = vpop.permute.xlu2 %44  }
  0x74   :  { %v10_v10 = vpop.permute.xlu0 %9   ;;  %v24_v11 = vpop.permute.xlu1 %23  }
  0x75   :  { %12 = vst.msk [vmem:[#allocation0] ss:$8 sm:$0x3] %vm11_vm1, %v10_v10  }
  0x7c   :  { %v17_v12 = vpop.permute.xlu0 %16   ;;  %v31_v13 = vpop.permute.xlu1 %30  }
  0x7d   :  { %19 = vst.msk [vmem:[#allocation0] ss:$8 sm:$0x3] %vm18_vm2, %v17_v12  }
  0x7e   :  { %26 = vst.msk [vmem:[#allocation0] ss:$8 sm:$0x3] %vm25_vm3, %v24_v11  }
  0x7f   :  { %33 = vst.msk [vmem:[#allocation0] ss:$8 sm:$0x3] %vm32_vm4, %v31_v13  }
  0x80   :  { %40 = vst.msk [vmem:[#allocation0] ss:$8 sm:$0x3] %vm39_vm5, %v38_v8  }
  0x81   :  { %47 = vst.msk [vmem:[#allocation0] ss:$8 sm:$0x3] %vm46_vm6, %v45_v9  }
  0x84   :  { %v52_v14 = vpop.permute.xlu0 %51  }
  0x85   :  { %54 = vst.msk [vmem:[#allocation0] ss:$8 sm:$0x3] %vm53_vm7, %v52_v14  }
  0x8c   :  { %v57_v15 = vld [vmem:[#allocation0] sm:$0x1]  ;;  %v62_v16 = vld [vmem:[#allocation0 + $0x8] sm:$0x1] }
  0x8d   :  { %60 = vst [vmem:[%s130_s1] sm:$0x1] %v57_v15 }
  0x8e   :  { %74 = vst [vmem:[%s130_s1 + $0x1] sm:$0x1] %v62_v16 }

// kernel: tile.53
= control target key start
LH: loop header
LB: loop body
LE: loop exit
PB: predicated region body
PF: predicated region fallthrough
CT: control target
= control target key end

     0   :  { %s22_s0 = inlined_call_operand.vmem [shape: f32[32], index: 0, kind: input, shape index: {}]   ;;  %s23_s1 = inlined_call_operand.vmem [shape: f32[8,32], index: 1, kind: output, shape index: {}]  }
   0x1   :  { %v4_v0 = vld [vmem:[%s22_s0] ss:$0 sm:$0xff] }
   0x2   :  { %5 = vst [vmem:[%s23_s1] sm:$0xff] %v4_v0 }

// kernel: tile.58
= control target key start
LH: loop header
LB: loop body
LE: loop exit
PB: predicated region body
PF: predicated region fallthrough
CT: control target
= control target key end

     0   :  { %s7_s6 = smov 3  ;;  %s46_s9 = smov 96   ;;  %vm4_vm0 = vcmask 261120   ;;  %vm11_vm1 = vcmask 1048320   ;;  %vm18_vm2 = vcmask 785920   ;;  %vm25_vm3 = vcmask 523520   ;;  %s77_s0 = inlined_call_operand.vmem [shape: f32[8,32], index: 0, kind: input, shape index: {}]   ;;  %s78_s1 = inlined_call_operand.vmem [shape: f32[1,256], index: 1, kind: output, shape index: {}]  }
   0x1   :  { %v39_v0 = vld [vmem:[%s77_s0 + $0x3] ss:$4 sm:%s7_s6]   ;;  %s21_s10 = smov 3  ;;  %s14_s13 = smov 3 }
   0x2   :  { %9 = vrot.lane.b32.xlu0 %v39_v0, %s46_s9  ;;  %v41_v1 = vld [vmem:[%s77_s0 + $0x1] ss:$4 sm:%s21_s10]   ;;  %s47_s14 = smov 32   ;;  %s48_s17 = smov 64  }
   0x3   :  { %23 = vrot.lane.b32.xlu1 %v41_v1, %s47_s14  ;;  %v40_v2 = vld [vmem:[%s77_s0 + $0x2] ss:$4 sm:%s14_s13]   ;;  %s2_s18 = smov 3 }
   0x4   :  { %v3_v3 = vld [vmem:[%s77_s0] ss:$4 sm:%s2_s18]  }
   0x5   :  { %5 = vst.msk [vmem:[#allocation0] ss:$8 sm:$0x3] %vm4_vm0, %v3_v3  }
   0xa   :  { %16 = vrot.lane.b32.xlu0 %v40_v2, %s48_s17 }
  0x74   :  { %v10_v4 = vpop.permute.xlu0 %9  }
  0x75   :  { %12 = vst.msk [vmem:[#allocation0] ss:$8 sm:$0x3] %vm11_vm1, %v10_v4   ;;  %v24_v5 = vpop.permute.xlu1 %23  }
  0x7c   :  { %v17_v6 = vpop.permute.xlu0 %16  }
  0x7d   :  { %19 = vst.msk [vmem:[#allocation0] ss:$8 sm:$0x3] %vm18_vm2, %v17_v6  }
  0x7e   :  { %26 = vst.msk [vmem:[#allocation0] ss:$8 sm:$0x3] %vm25_vm3, %v24_v5  }
  0x85   :  { %v29_v7 = vld [vmem:[#allocation0] sm:$0x1]  ;;  %v34_v8 = vld [vmem:[#allocation0 + $0x8] sm:$0x1] }
  0x86   :  { %32 = vst [vmem:[%s78_s1] sm:$0x1] %v29_v7 }
  0x87   :  { %42 = vst [vmem:[%s78_s1 + $0x1] sm:$0x1] %v34_v8 }

// kernel: encoder_forward.1
= control target key start
LH: loop header
LB: loop body
LE: loop exit
PB: predicated region body
PF: predicated region fallthrough
CT: control target
= control target key end

     0   :  { %s2247_s13 = smov 0   ;;  %s3740_s0 = inlined_call_operand.vmem [shape: f32[2,32,96], index: 0, kind: input, shape index: {}]   ;;  %s3741_s1 = inlined_call_operand.vmem [shape: f32[3,96,256], index: 1, kind: input, shape index: {}]   ;;  %s3742_s2 = inlined_call_operand.vmem [shape: f32[2,256], index: 2, kind: input, shape index: {}]   ;;  %s3743_s3 = inlined_call_operand.vmem [shape: f32[256,256], index: 3, kind: input, shape index: {}]   ;;  %s3744_s4 = inlined_call_operand.vmem [shape: f32[3,128,256], index: 4, kind: input, shape index: {}]   ;;  %s3745_s5 = inlined_call_operand.vmem [shape: f32[2,256], index: 5, kind: input, shape index: {}]   ;;  %s3746_s6 = inlined_call_operand.vmem [shape: f32[256,256], index: 6, kind: input, shape index: {}]   ;;  %s3747_s7 = inlined_call_operand.vmem [shape: f32[3,128,256], index: 7, kind: input, shape index: {}]   ;;  %s3748_s8 = inlined_call_operand.vmem [shape: f32[2,256], index: 8, kind: input, shape index: {}]   ;;  %s3749_s9 = inlined_call_operand.vmem [shape: f32[256,256], index: 9, kind: input, shape index: {}]   ;;  %s3750_s10 = inlined_call_operand.vmem [shape: f32[2,4,128], index: 10, kind: output, shape index: {}]  }
   0x1 LB: > { %s1894_s14 = sadd.s32 4294967295, %s2189_s13   ;;  %p1898_p0 = scmp.ge.s32.totalorder %s2189_s13, 1  ;;  %s2189_s13 = sphi %s2247_s13, %s20_s13  }
   0x2   : > { %p312_p1 = scmp.lt.s32.totalorder %s2189_s13, 3 }
   0x4   : > { %p313_p2 = pnand %p1898_p0, %p312_p1 }
   0x5   : > { %p349_p3 = scmp.lt.s32.totalorder (!%p313_p2), %s1894_s14, 1 }
   0x6   : > { %316 = sbr.rel (%p313_p2) target bundleno = 1024 (0x400), region = 60 }
   0xb   : > { %v1924_v0 = vld [vmem:[%s3741_s1 + $0x170] sm:$0xff]  ;;  %v1925_v1 = vld [vmem:[%s3741_s1 + $0x178] sm:$0xff]  ;;  %v1922_v2 = vld [vmem:[%s3741_s1 + $0x160] sm:$0xff]  ;;  %s3752_s14 = smov (!%p349_p3, %s1894_s14), 1  ;;  %vm362_vm0 = vcmask 778240   ;;  %vm365_vm1 = vcmask 785408  }
   0xc   : > { %2122 = vmatpush.msra.mxu2 %v1924_v0  ;;  %2134 = vmatpush.msra.mxu3 %v1925_v1  ;;  %v1923_v3 = vld [vmem:[%s3741_s1 + $0x168] sm:$0xff]  ;;  %v1920_v4 = vld [vmem:[%s3741_s1 + $0x150] sm:$0xff]  ;;  %v1921_v5 = vld [vmem:[%s3741_s1 + $0x158] sm:$0xff]  ;;  %s2121_s11 = sshll.u32 %s3752_s14, 5  ;;  %v2191_v12 = vmov 0.0   ;;  %s1901_s26 = sshll.u32 %s3752_s14, 2 }
   0xd   : > { %443 = vmatpush.msra.mxu0 %v1924_v0  ;;  %472 = vmatpush.msra.mxu1 %v1925_v1  ;;  %v1918_v6 = vld [vmem:[%s3741_s1 + $0x140] sm:$0xff]  ;;  %v1919_v7 = vld [vmem:[%s3741_s1 + $0x148] sm:$0xff]  ;;  %v1916_v8 = vld [vmem:[%s3741_s1 + $0x130] sm:$0xff]  ;;  %s2291_s20 = scalar_lea.vmem %s3740_s0, %s2121_s11  ;;  %363 = vst.msk [vmem:[#allocation2] sm:$0x1] %vm362_vm0, %v2191_v12  ;;  %s357_s29 = scalar_lea.vmem %s3750_s10, %s1901_s26 }
   0xe   : > { %2123 = vmatpush.msra.mxu2 %v1922_v2  ;;  %2135 = vmatpush.msra.mxu3 %v1923_v3  ;;  %v1917_v9 = vld [vmem:[%s3741_s1 + $0x138] sm:$0xff]  ;;  %v1914_v10 = vld [vmem:[%s3741_s1 + $0x120] sm:$0xff]  ;;  %v1915_v11 = vld [vmem:[%s3741_s1 + $0x128] sm:$0xff]  ;;  %364 = vst.msk [vmem:[#allocation2 + $0x21] sm:$0x1] %vm362_vm0, %v2191_v12 }
   0xf   : > { %444 = vmatpush.msra.mxu0 %v1922_v2  ;;  %473 = vmatpush.msra.mxu1 %v1923_v3  ;;  %v1912_v13 = vld [vmem:[%s3741_s1 + $0x110] sm:$0xff]  ;;  %v1913_v14 = vld [vmem:[%s3741_s1 + $0x118] sm:$0xff]  ;;  %v358_v15 = vld [vmem:[%s2291_s20] sm:$0xff]  ;;  %964 = vst [vmem:[#allocation4] sm:$0x1] %v2191_v12 }
  0x10   : > { %2124 = vmatpush.msra.mxu2 %v1920_v4  ;;  %2136 = vmatpush.msra.mxu3 %v1921_v5  ;;  %366 = vst.msk [vmem:[#allocation2 + $0x1] sm:$0xff] %vm365_vm1, %v358_v15  ;;  %v1910_v16 = vld [vmem:[%s3741_s1 + $0x100] sm:$0xff]  ;;  %v1911_v17 = vld [vmem:[%s3741_s1 + $0x108] sm:$0xff]  ;;  %v1908_v18 = vld [vmem:[%s3741_s1 + $0xf0] sm:$0xff] }
  0x11   : > { %445 = vmatpush.msra.mxu0 %v1920_v4  ;;  %474 = vmatpush.msra.mxu1 %v1921_v5  ;;  %965 = vst [vmem:[#allocation4 + $0x11] sm:$0x1] %v2191_v12  ;;  %v1909_v19 = vld [vmem:[%s3741_s1 + $0xf8] sm:$0xff]  ;;  %v1906_v20 = vld [vmem:[%s3741_s1 + $0xe0] sm:$0xff]  ;;  %v1907_v21 = vld [vmem:[%s3741_s1 + $0xe8] sm:$0xff] }
  0x12   : > { %2125 = vmatpush.msra.mxu2 %v1918_v6  ;;  %2137 = vmatpush.msra.mxu3 %v1919_v7  ;;  %1431 = vst [vmem:[#allocation6] sm:$0x1] %v2191_v12  ;;  %v359_v22 = vld [vmem:[%s2291_s20 + $0x8] sm:$0xff]  ;;  %v361_v23 = vld [vmem:[%s2291_s20 + $0x18] sm:$0xff]  ;;  %v1904_v24 = vld [vmem:[%s3741_s1 + $0xd0] sm:$0xff] }
  0x13   : > { %446 = vmatpush.msra.mxu0 %v1918_v6  ;;  %475 = vmatpush.msra.mxu1 %v1919_v7  ;;  %1432 = vst [vmem:[#allocation6 + $0x9] sm:$0x1] %v2191_v12  ;;  %v1905_v25 = vld [vmem:[%s3741_s1 + $0xd8] sm:$0xff]  ;;  %v1902_v26 = vld [vmem:[%s3741_s1 + $0xc0] sm:$0xff]  ;;  %v1903_v27 = vld [vmem:[%s3741_s1 + $0xc8] sm:$0xff] }
  0x14   : > { %2126 = vmatpush.msra.mxu2 %v1916_v8  ;;  %2138 = vmatpush.msra.mxu3 %v1917_v9  ;;  %367 = vst.msk [vmem:[#allocation2 + $0x9] sm:$0xff] %vm365_vm1, %v359_v22  ;;  %v396_v28 = vld [vmem:[%s3741_s1 + $0xb0] sm:$0xff]  ;;  %v397_v29 = vld [vmem:[%s3741_s1 + $0xb8] sm:$0xff]  ;;  %v394_v31 = vld [vmem:[%s3741_s1 + $0xa0] sm:$0xff] }
  0x15   : > { %447 = vmatpush.msra.mxu0 %v1916_v8  ;;  %476 = vmatpush.msra.mxu1 %v1917_v9  ;;  %369 = vst.msk [vmem:[#allocation2 + $0x19] sm:$0xff] %vm365_vm1, %v361_v23  ;;  %v360_v30 = vld [vmem:[%s2291_s20 + $0x10] sm:$0xff]  ;;  %v395_v32 = vld [vmem:[%s3741_s1 + $0xa8] sm:$0xff]  ;;  %v393_v35 = vld [vmem:[%s3741_s1 + $0x98] sm:$0xff] }
  0x16   : > { %2127 = vmatpush.msra.mxu2 %v1914_v10  ;;  %2139 = vmatpush.msra.mxu3 %v1915_v11  ;;  %368 = vst.msk [vmem:[#allocation2 + $0x11] sm:$0xff] %vm365_vm1, %v360_v30  ;;  %v392_v34 = vld [vmem:[%s3741_s1 + $0x90] sm:$0xff]  ;;  %v1965_v37 = vld [vmem:[%s3741_s1 + $0x238] sm:$0xff]  ;;  %v390_v38 = vld [vmem:[%s3741_s1 + $0x80] sm:$0xff] }
  0x17   : > { %448 = vmatpush.msra.mxu0 %v1914_v10  ;;  %477 = vmatpush.msra.mxu1 %v1915_v11  ;;  %v398_v33 = vld [vmem:[#allocation2 + $0x1] sm:$0xff]  ;;  %v1964_v36 = vld [vmem:[%s3741_s1 + $0x230] sm:$0xff]  ;;  %v389_v43 = vld [vmem:[%s3741_s1 + $0x78] sm:$0xff] }
  0x18   : > { %2128 = vmatpush.msra.mxu2 %v1912_v13  ;;  %2140 = vmatpush.msra.mxu3 %v1913_v14  ;;  %v391_v39 = vld [vmem:[%s3741_s1 + $0x88] sm:$0xff]  ;;  %v1962_v40 = vld [vmem:[%s3741_s1 + $0x220] sm:$0xff]  ;;  %v388_v42 = vld [vmem:[%s3741_s1 + $0x70] sm:$0xff] }
  0x19   : > { %449 = vmatpush.msra.mxu0 %v1912_v13  ;;  %478 = vmatpush.msra.mxu1 %v1913_v14  ;;  %v1963_v41 = vld [vmem:[%s3741_s1 + $0x228] sm:$0xff]  ;;  %v1960_v44 = vld [vmem:[%s3741_s1 + $0x210] sm:$0xff]  ;;  %v1961_v45 = vld [vmem:[%s3741_s1 + $0x218] sm:$0xff] }
  0x1a   : > { %2129 = vmatpush.msra.mxu2 %v1910_v16  ;;  %2141 = vmatpush.msra.mxu3 %v1911_v17  ;;  %v386_v46 = vld [vmem:[%s3741_s1 + $0x60] sm:$0xff]  ;;  %v387_v47 = vld [vmem:[%s3741_s1 + $0x68] sm:$0xff]  ;;  %v384_v50 = vld [vmem:[%s3741_s1 + $0x50] sm:$0xff] }
  0x1b   : > { %450 = vmatpush.msra.mxu0 %v1910_v16  ;;  %479 = vmatpush.msra.mxu1 %v1911_v17  ;;  %v1958_v48 = vld [vmem:[%s3741_s1 + $0x200] sm:$0xff]  ;;  %v1959_v49 = vld [vmem:[%s3741_s1 + $0x208] sm:$0xff]  ;;  %v385_v51 = vld [vmem:[%s3741_s1 + $0x58] sm:$0xff] }
  0x1c   : > { %2130 = vmatpush.msra.mxu2 %v1908_v18  ;;  %2142 = vmatpush.msra.mxu3 %v1909_v19  ;;  %v399_v52 = vld [vmem:[#allocation2 + $0x9] sm:$0xff]  ;;  %v401_v53 = vld [vmem:[#allocation2 + $0x19] sm:$0xff] }
  0x1d   : > { %451 = vmatpush.msra.mxu0 %v1908_v18  ;;  %480 = vmatpush.msra.mxu1 %v1909_v19  ;;  %v382_v54 = vld [vmem:[%s3741_s1 + $0x40] sm:$0xff]  ;;  %v383_v55 = vld [vmem:[%s3741_s1 + $0x48] sm:$0xff]  ;;  %v1956_v56 = vld [vmem:[%s3741_s1 + $0x1f0] sm:$0xff] }
  0x1e   : > { %2131 = vmatpush.msra.mxu2 %v1906_v20  ;;  %2143 = vmatpush.msra.mxu3 %v1907_v21  ;;  %v1957_v57 = vld [vmem:[%s3741_s1 + $0x1f8] sm:$0xff]  ;;  %v380_v58 = vld [vmem:[%s3741_s1 + $0x30] sm:$0xff]  ;;  %v1954_v60 = vld [vmem:[%s3741_s1 + $0x1e0] sm:$0xff] }
  0x1f   : > { %452 = vmatpush.msra.mxu0 %v1906_v20  ;;  %481 = vmatpush.msra.mxu1 %v1907_v21  ;;  %v381_v59 = vld [vmem:[%s3741_s1 + $0x38] sm:$0xff]  ;;  %v1955_v61 = vld [vmem:[%s3741_s1 + $0x1e8] sm:$0xff]  ;;  %v378_v62 = vld [vmem:[%s3741_s1 + $0x20] sm:$0xff] }
  0x20   : > { %2132 = vmatpush.msra.mxu2 %v1904_v24  ;;  %2144 = vmatpush.msra.mxu3 %v1905_v25  ;;  %v379_v63 = vld [vmem:[%s3741_s1 + $0x28] sm:$0xff]  ;;  %v1952_v0 = vld [vmem:[%s3741_s1 + $0x1d0] sm:$0xff]  ;;  %v1953_v1 = vld [vmem:[%s3741_s1 + $0x1d8] sm:$0xff] }
  0x21   : > { %453 = vmatpush.msra.mxu0 %v1904_v24  ;;  %482 = vmatpush.msra.mxu1 %v1905_v25  ;;  %v376_v2 = vld [vmem:[%s3741_s1 + $0x10] sm:$0xff]  ;;  %v377_v3 = vld [vmem:[%s3741_s1 + $0x18] sm:$0xff]  ;;  %v1950_v4 = vld [vmem:[%s3741_s1 + $0x1c0] sm:$0xff] }
  0x22   : > { %2133 = vmatpush.msra.mxu2 %v1902_v26  ;;  %2145 = vmatpush.msra.mxu3 %v1903_v27  ;;  %v1951_v5 = vld [vmem:[%s3741_s1 + $0x1c8] sm:$0xff]  ;;  %v374_v6 = vld [vmem:[%s3741_s1] sm:$0xff]  ;;  %v400_v8 = vld [vmem:[#allocation2 + $0x11] sm:$0xff] }
  0x23   : > { %454 = vmatpush.msra.mxu0 %v1902_v26  ;;  %483 = vmatpush.msra.mxu1 %v1903_v27  ;;  %v375_v7 = vld [vmem:[%s3741_s1 + $0x8] sm:$0xff]  ;;  %v370_v9 = vld [vmem:[#allocation2] sm:$0xff]  ;;  %v1948_v10 = vld [vmem:[%s3741_s1 + $0x1b0] sm:$0xff] }
  0x24   : > { %513 = vmatpush.msrb.mxu2 %v396_v28  ;;  %542 = vmatpush.msrb.mxu3 %v397_v29  ;;  %v1949_v11 = vld [vmem:[%s3741_s1 + $0x1b8] sm:$0xff]  ;;  %v1946_v12 = vld [vmem:[%s3741_s1 + $0x1a0] sm:$0xff]  ;;  %v1947_v13 = vld [vmem:[%s3741_s1 + $0x1a8] sm:$0xff] }
  0x25   : > { %1926 = vmatmul.msk.f32.vlgmr.msra.gmra.mxu0 %vm365_vm1, %v398_v33  ;;  %1930 = vmatmul.msk.f32.vlgmr.msra.gmra.mxu1 %vm365_vm1, %v398_v33  ;;  %v1944_v14 = vld [vmem:[%s3741_s1 + $0x190] sm:$0xff]  ;;  %v1945_v15 = vld [vmem:[%s3741_s1 + $0x198] sm:$0xff]  ;;  %v1942_v16 = vld [vmem:[%s3741_s1 + $0x180] sm:$0xff] }
  0x26   : > { %514 = vmatpush.msrb.mxu2 %v394_v31  ;;  %543 = vmatpush.msrb.mxu3 %v395_v32  ;;  %v1943_v17 = vld [vmem:[%s3741_s1 + $0x188] sm:$0xff]  ;;  %v372_v20 = vld [vmem:[#allocation2 + $0x10] sm:$0xff]  ;;  %v373_v22 = vld [vmem:[#allocation2 + $0x18] sm:$0xff] }
  0x27   : > { %612 = vmatpush.msrb.mxu0 %v1964_v36  ;;  %641 = vmatpush.msrb.mxu1 %v1965_v37  ;;  %v371_v18 = vld [vmem:[#allocation2 + $0x8] sm:$0xff]  ;;  %v569_v23 = vld [vmem:[#allocation2 + $0x12] sm:$0xff]  ;;  %v570_v24 = vld [vmem:[#allocation2 + $0x1a] sm:$0xff] }
  0x28   : > { %515 = vmatpush.msrb.mxu2 %v392_v34  ;;  %544 = vmatpush.msrb.mxu3 %v393_v35  ;;  %v567_v19 = vld [vmem:[#allocation2 + $0x2] sm:$0xff]  ;;  %v568_v21 = vld [vmem:[#allocation2 + $0xa] sm:$0xff]  ;;  %v798_v27 = vld [vmem:[%s3743_s3 + $0xf8] sm:$0xff] }
  0x29   : > { %613 = vmatpush.msrb.mxu0 %v1962_v40  ;;  %642 = vmatpush.msrb.mxu1 %v1963_v41  ;;  %v797_v25 = vld [vmem:[%s3743_s3 + $0xf0] sm:$0xff]  ;;  %v830_v28 = vld [vmem:[%s3743_s3 + $0x1f8] sm:$0xff]  ;;  %v795_v29 = vld [vmem:[%s3743_s3 + $0xe0] sm:$0xff] }
  0x2a   : > { %516 = vmatpush.msrb.mxu2 %v390_v38  ;;  %545 = vmatpush.msrb.mxu3 %v391_v39  ;;  %v829_v26 = vld [vmem:[%s3743_s3 + $0x1f0] sm:$0xff]  ;;  %v827_v30 = vld [vmem:[%s3743_s3 + $0x1e0] sm:$0xff]  ;;  %v796_v31 = vld [vmem:[%s3743_s3 + $0xe8] sm:$0xff] }
  0x2b   : > { %614 = vmatpush.msrb.mxu0 %v1960_v44  ;;  %643 = vmatpush.msrb.mxu1 %v1961_v45  ;;  %v828_v32 = vld [vmem:[%s3743_s3 + $0x1e8] sm:$0xff]  ;;  %v793_v33 = vld [vmem:[%s3743_s3 + $0xd0] sm:$0xff]  ;;  %v794_v35 = vld [vmem:[%s3743_s3 + $0xd8] sm:$0xff] }
  0x2c   : > { %517 = vmatpush.msrb.mxu2 %v388_v42  ;;  %546 = vmatpush.msrb.mxu3 %v389_v43  ;;  %v825_v34 = vld [vmem:[%s3743_s3 + $0x1d0] sm:$0xff]  ;;  %v826_v36 = vld [vmem:[%s3743_s3 + $0x1d8] sm:$0xff]  ;;  %v791_v37 = vld [vmem:[%s3743_s3 + $0xc0] sm:$0xff] }
  0x2d   : > { %615 = vmatpush.msrb.mxu0 %v1958_v48  ;;  %644 = vmatpush.msrb.mxu1 %v1959_v49  ;;  %v823_v38 = vld [vmem:[%s3743_s3 + $0x1c0] sm:$0xff]  ;;  %v792_v39 = vld [vmem:[%s3743_s3 + $0xc8] sm:$0xff]  ;;  %v789_v42 = vld [vmem:[%s3743_s3 + $0xb0] sm:$0xff] }
  0x2e   : > { %518 = vmatpush.msrb.mxu2 %v386_v46  ;;  %547 = vmatpush.msrb.mxu3 %v387_v47  ;;  %v824_v40 = vld [vmem:[%s3743_s3 + $0x1c8] sm:$0xff]  ;;  %v821_v43 = vld [vmem:[%s3743_s3 + $0x1b0] sm:$0xff]  ;;  %v790_v45 = vld [vmem:[%s3743_s3 + $0xb8] sm:$0xff] }
  0x2f   : > { %1927 = vmatmul.msk.f32.gmra.mxu0 %vm365_vm1, %v399_v52  ;;  %1929 = vmatmul.msk.f32.vlgmr.msra.gmra.mxu2 %vm365_vm1, %v401_v53  ;;  %v822_v46 = vld [vmem:[%s3743_s3 + $0x1b8] sm:$0xff]  ;;  %v787_v47 = vld [vmem:[%s3743_s3 + $0xa0] sm:$0xff]  ;;  %v788_v49 = vld [vmem:[%s3743_s3 + $0xa8] sm:$0xff] }
  0x30   : > { %519 = vmatpush.msrb.mxu2 %v384_v50  ;;  %548 = vmatpush.msrb.mxu3 %v385_v51  ;;  %v819_v48 = vld [vmem:[%s3743_s3 + $0x1a0] sm:$0xff]  ;;  %v820_v50 = vld [vmem:[%s3743_s3 + $0x1a8] sm:$0xff]  ;;  %v785_v51 = vld [vmem:[%s3743_s3 + $0x90] sm:$0xff] }
  0x31   : > { %1931 = vmatmul.msk.f32.gmra.mxu1 %vm365_vm1, %v399_v52  ;;  %1933 = vmatmul.msk.f32.vlgmr.msra.gmra.mxu3 %vm365_vm1, %v401_v53  ;;  %v817_v52 = vld [vmem:[%s3743_s3 + $0x190] sm:$0xff]  ;;  %v786_v53 = vld [vmem:[%s3743_s3 + $0x98] sm:$0xff] }
  0x32   : > { %520 = vmatpush.msrb.mxu2 %v382_v54  ;;  %549 = vmatpush.msrb.mxu3 %v383_v55  ;;  %v818_v54 = vld [vmem:[%s3743_s3 + $0x198] sm:$0xff]  ;;  %v783_v55 = vld [vmem:[%s3743_s3 + $0x80] sm:$0xff] }
  0x33   : > { %616 = vmatpush.msrb.mxu0 %v1956_v56  ;;  %645 = vmatpush.msrb.mxu1 %v1957_v57  ;;  %v815_v56 = vld [vmem:[%s3743_s3 + $0x180] sm:$0xff]  ;;  %v784_v57 = vld [vmem:[%s3743_s3 + $0x88] sm:$0xff] }
  0x34   : > { %521 = vmatpush.msrb.mxu2 %v380_v58  ;;  %550 = vmatpush.msrb.mxu3 %v381_v59  ;;  %v816_v58 = vld [vmem:[%s3743_s3 + $0x188] sm:$0xff]  ;;  %v781_v59 = vld [vmem:[%s3743_s3 + $0x70] sm:$0xff] }
  0x35   : > { %617 = vmatpush.msrb.mxu0 %v1954_v60  ;;  %646 = vmatpush.msrb.mxu1 %v1955_v61  ;;  %v813_v60 = vld [vmem:[%s3743_s3 + $0x170] sm:$0xff]  ;;  %v782_v61 = vld [vmem:[%s3743_s3 + $0x78] sm:$0xff] }
  0x36   : > { %522 = vmatpush.msrb.mxu2 %v378_v62  ;;  %551 = vmatpush.msrb.mxu3 %v379_v63  ;;  %v814_v62 = vld [vmem:[%s3743_s3 + $0x178] sm:$0xff] }
  0x37   : > { %618 = vmatpush.msrb.mxu0 %v1952_v0  ;;  %647 = vmatpush.msrb.mxu1 %v1953_v1  ;;  %v779_v0 = vld [vmem:[%s3743_s3 + $0x60] sm:$0xff] }
  0x38   : > { %523 = vmatpush.msrb.mxu2 %v376_v2  ;;  %552 = vmatpush.msrb.mxu3 %v377_v3  ;;  %v811_v1 = vld [vmem:[%s3743_s3 + $0x160] sm:$0xff]  ;;  %v780_v2 = vld [vmem:[%s3743_s3 + $0x68] sm:$0xff] }
  0x39   : > { %619 = vmatpush.msrb.mxu0 %v1950_v4  ;;  %648 = vmatpush.msrb.mxu1 %v1951_v5  ;;  %v812_v4 = vld [vmem:[%s3743_s3 + $0x168] sm:$0xff]  ;;  %v777_v5 = vld [vmem:[%s3743_s3 + $0x50] sm:$0xff] }
  0x3a   : > { %524 = vmatpush.msrb.mxu2 %v374_v6  ;;  %553 = vmatpush.msrb.mxu3 %v375_v7  ;;  %v809_v6 = vld [vmem:[%s3743_s3 + $0x150] sm:$0xff]  ;;  %v778_v7 = vld [vmem:[%s3743_s3 + $0x58] sm:$0xff] }
  0x3b   : > { %1928 = vmatmul.msk.f32.gmra.mxu0 %vm365_vm1, %v400_v8  ;;  %1932 = vmatmul.msk.f32.gmra.mxu1 %vm365_vm1, %v400_v8  ;;  %v810_v8 = vld [vmem:[%s3743_s3 + $0x158] sm:$0xff] }
  0x3c   : > { %1934 = vmatmul.msk.f32.vlgmr.msrb.gmra.mxu2 %vm365_vm1, %v370_v9  ;;  %1938 = vmatmul.msk.f32.vlgmr.msrb.gmra.mxu3 %vm365_vm1, %v370_v9  ;;  %v775_v9 = vld [vmem:[%s3743_s3 + $0x40] sm:$0xff] }
  0x3d   : > { %620 = vmatpush.msrb.mxu0 %v1948_v10  ;;  %649 = vmatpush.msrb.mxu1 %v1949_v11  ;;  %v807_v10 = vld [vmem:[%s3743_s3 + $0x140] sm:$0xff]  ;;  %v776_v11 = vld [vmem:[%s3743_s3 + $0x48] sm:$0xff] }
  0x3e   : > { %831 = vmatpush.msra.mxu2 %v797_v25  ;;  %860 = vmatpush.msra.mxu3 %v829_v26  ;;  %v769_v25 = vld [vmem:[%s3743_s3 + $0x10] sm:$0xff] }
  0x3f   : > { %621 = vmatpush.msrb.mxu0 %v1946_v12  ;;  %650 = vmatpush.msrb.mxu1 %v1947_v13  ;;  %v808_v12 = vld [vmem:[%s3743_s3 + $0x148] sm:$0xff]  ;;  %v773_v13 = vld [vmem:[%s3743_s3 + $0x30] sm:$0xff] }
  0x40   : > { %832 = vmatpush.msra.mxu2 %v795_v29  ;;  %861 = vmatpush.msra.mxu3 %v827_v30  ;;  %v801_v26 = vld [vmem:[%s3743_s3 + $0x110] sm:$0xff]  ;;  %v767_v29 = vld [vmem:[%s3743_s3] sm:$0xff] }
  0x41   : > { %622 = vmatpush.msrb.mxu0 %v1944_v14  ;;  %651 = vmatpush.msrb.mxu1 %v1945_v15  ;;  %v805_v14 = vld [vmem:[%s3743_s3 + $0x130] sm:$0xff]  ;;  %v774_v15 = vld [vmem:[%s3743_s3 + $0x38] sm:$0xff]  ;;  %v799_v30 = vld [vmem:[%s3743_s3 + $0x100] sm:$0xff] }
  0x42   : > { %833 = vmatpush.msra.mxu2 %v793_v33  ;;  %862 = vmatpush.msra.mxu3 %v825_v34  ;;  %v674_v33 = vld [vmem:[%s3742_s2] ss:$2 sm:$0x3] }
  0x43   : > { %623 = vmatpush.msrb.mxu0 %v1942_v16  ;;  %652 = vmatpush.msrb.mxu1 %v1943_v17 }
  0x44   : > { %1935 = vmatmul.msk.f32.gmra.mxu2 %vm365_vm1, %v371_v18  ;;  %1939 = vmatmul.msk.f32.gmra.mxu3 %vm365_vm1, %v371_v18  ;;  %v806_v18 = vld [vmem:[%s3743_s3 + $0x138] sm:$0xff] }
  0x45   : > { %1966 = vmatmul.msk.f32.vlgmr.msrb.gmra.mxu0 %vm365_vm1, %v567_v19  ;;  %1970 = vmatmul.msk.f32.vlgmr.msrb.gmra.mxu1 %vm365_vm1, %v567_v19  ;;  %v771_v19 = vld [vmem:[%s3743_s3 + $0x20] sm:$0xff] }
  0x46   : > { %889 = vmatpush.msra.mxu0 %v798_v27  ;;  %918 = vmatpush.msra.mxu1 %v830_v28  ;;  %v770_v27 = vld [vmem:[%s3743_s3 + $0x18] sm:$0xff] }
  0x47   : > { %834 = vmatpush.msra.mxu2 %v791_v37  ;;  %863 = vmatpush.msra.mxu3 %v823_v38  ;;  %v802_v28 = vld [vmem:[%s3743_s3 + $0x118] sm:$0xff]  ;;  %v1974_v38 = vld [vmem:[%s3742_s2 + $0x1] ss:$2 sm:$0x3] }
  0x48   : > { %890 = vmatpush.msra.mxu0 %v796_v31  ;;  %919 = vmatpush.msra.mxu1 %v828_v32  ;;  %v768_v31 = vld [vmem:[%s3743_s3 + $0x8] sm:$0xff] }
  0x49   : > { %835 = vmatpush.msra.mxu2 %v789_v42  ;;  %864 = vmatpush.msra.mxu3 %v821_v43  ;;  %v800_v32 = vld [vmem:[%s3743_s3 + $0x108] sm:$0xff] }
  0x4a   : > { %891 = vmatpush.msra.mxu0 %v794_v35  ;;  %920 = vmatpush.msra.mxu1 %v826_v36 }
  0x4b   : > { %836 = vmatpush.msra.mxu2 %v787_v47  ;;  %865 = vmatpush.msra.mxu3 %v819_v48  ;;  %v2729_v48 = vperm.slane %v1974_v38, 1 }
  0x4c   : > { %1936 = vmatmul.msk.f32.gmra.mxu2 %vm365_vm1, %v372_v20  ;;  %1940 = vmatmul.msk.f32.gmra.mxu3 %vm365_vm1, %v372_v20  ;;  %v803_v20 = vld [vmem:[%s3743_s3 + $0x120] sm:$0xff] }
  0x4d   : > { %1967 = vmatmul.msk.f32.gmra.mxu0 %vm365_vm1, %v568_v21  ;;  %1971 = vmatmul.msk.f32.gmra.mxu1 %vm365_vm1, %v568_v21  ;;  %v772_v21 = vld [vmem:[%s3743_s3 + $0x28] sm:$0xff] }
  0x4e   : > { %892 = vmatpush.msra.mxu0 %v792_v39  ;;  %921 = vmatpush.msra.mxu1 %v824_v40  ;;  %v2723_v39 = vperm.slane %v674_v33, 0  ;;  %v2725_v40 = vperm.slane %v674_v33, 1 }
  0x4f   : > { %837 = vmatpush.msra.mxu2 %v785_v51  ;;  %866 = vmatpush.msra.mxu3 %v817_v52 }
  0x50   : > { %893 = vmatpush.msra.mxu0 %v790_v45  ;;  %922 = vmatpush.msra.mxu1 %v822_v46  ;;  %v2727_v46 = vperm.slane %v1974_v38, 0 }
  0x51   : > { %838 = vmatpush.msra.mxu2 %v783_v55  ;;  %867 = vmatpush.msra.mxu3 %v815_v56 }
  0x52   : > { %894 = vmatpush.msra.mxu0 %v788_v49  ;;  %923 = vmatpush.msra.mxu1 %v820_v50 }
  0x53   : > { %839 = vmatpush.msra.mxu2 %v781_v59  ;;  %868 = vmatpush.msra.mxu3 %v813_v60 }
  0x54   : > { %1937 = vmatmul.msk.f32.gmra.mxu2 %vm365_vm1, %v373_v22  ;;  %1941 = vmatmul.msk.f32.gmra.mxu3 %vm365_vm1, %v373_v22  ;;  %v804_v22 = vld [vmem:[%s3743_s3 + $0x128] sm:$0xff] }
  0x55   : > { %1968 = vmatmul.msk.f32.gmra.mxu0 %vm365_vm1, %v569_v23  ;;  %1972 = vmatmul.msk.f32.gmra.mxu1 %vm365_vm1, %v569_v23 }
  0x56   : > { %895 = vmatpush.msra.mxu0 %v786_v53  ;;  %924 = vmatpush.msra.mxu1 %v818_v54 }
  0x57   : > { %840 = vmatpush.msra.mxu2 %v779_v0  ;;  %869 = vmatpush.msra.mxu3 %v811_v1 }
  0x58   : > { %896 = vmatpush.msra.mxu0 %v784_v57  ;;  %925 = vmatpush.msra.mxu1 %v816_v58 }
  0x59   : > { %841 = vmatpush.msra.mxu2 %v777_v5  ;;  %870 = vmatpush.msra.mxu3 %v809_v6 }
  0x5a   : > { %897 = vmatpush.msra.mxu0 %v782_v61  ;;  %926 = vmatpush.msra.mxu1 %v814_v62 }
  0x5b   : > { %842 = vmatpush.msra.mxu2 %v775_v9  ;;  %871 = vmatpush.msra.mxu3 %v807_v10 }
  0x5c   : > { %898 = vmatpush.msra.mxu0 %v780_v2  ;;  %927 = vmatpush.msra.mxu1 %v812_v4 }
  0x5d   : > { %1969 = vmatmul.msk.f32.gmra.mxu0 %vm365_vm1, %v570_v24  ;;  %1973 = vmatmul.msk.f32.gmra.mxu1 %vm365_vm1, %v570_v24 }
  0x5e   : > { %899 = vmatpush.msra.mxu0 %v778_v7  ;;  %928 = vmatpush.msra.mxu1 %v810_v8 }
  0x5f   : > { %843 = vmatpush.msra.mxu2 %v773_v13  ;;  %872 = vmatpush.msra.mxu3 %v805_v14 }
  0x60   : > { %900 = vmatpush.msra.mxu0 %v776_v11  ;;  %929 = vmatpush.msra.mxu1 %v808_v12 }
  0x61   : > { %844 = vmatpush.msra.mxu2 %v771_v19  ;;  %873 = vmatpush.msra.mxu3 %v803_v20  ;;  %v2013_v20 = vld [vmem:[%s3744_s4 + $0x1f0] sm:$0xff] }
  0x62   : > { %901 = vmatpush.msra.mxu0 %v774_v15  ;;  %930 = vmatpush.msra.mxu1 %v806_v18 }
  0x63   : > { %845 = vmatpush.msra.mxu2 %v769_v25  ;;  %874 = vmatpush.msra.mxu3 %v801_v26 }
  0x64   : > { %902 = vmatpush.msra.mxu0 %v772_v21  ;;  %931 = vmatpush.msra.mxu1 %v804_v22  ;;  %v2014_v21 = vld [vmem:[%s3744_s4 + $0x1f8] sm:$0xff] }
  0x65   : > { %846 = vmatpush.msra.mxu2 %v767_v29  ;;  %875 = vmatpush.msra.mxu3 %v799_v30 }
  0x66   : > { %903 = vmatpush.msra.mxu0 %v770_v27  ;;  %932 = vmatpush.msra.mxu1 %v802_v28 }
  0x67   : > { %1037 = vmatpush.msrb.mxu2 %v2013_v20  ;;  %1060 = vmatpush.msrb.mxu3 %v2014_v21  ;;  %v2012_v20 = vld [vmem:[%s3744_s4 + $0x1e8] sm:$0xff]  ;;  %v2009_v21 = vld [vmem:[%s3744_s4 + $0x1d0] sm:$0xff] }
  0x68   : > { %904 = vmatpush.msra.mxu0 %v768_v31  ;;  %933 = vmatpush.msra.mxu1 %v800_v32 }
  0x69   : > { %1061 = vmatpush.msrb.mxu3 %v2012_v20  ;;  %v2038_v20 = vld [vmem:[%s3744_s4 + $0x2b8] sm:$0xff] }
  0xa2   : > { %v2559_v41 = vpop.f32.mrf.mxu0  ;;  %v2567_v44 = vpop.f32.mrf.mxu1 }
  0xac   : > { %v2623_v63 = vpop.f32.mrf.mxu0 }
  0xae   : > { %v2634_v3 = vpop.f32.mrf.mxu1 }
  0xb2   : > { %v2672_v16 = vpop.f32.mrf.mxu2 }
  0xb4   : > { %v2674_v17 = vpop.f32.mrf.mxu3 }
  0xb8   : > { %v462_v23 = vpop.f32.mrf.mxu0  ;;  %v491_v24 = vpop.f32.mrf.mxu1 }
  0xbf   : > { %v526_v34 = vpop.f32.mrf.mxu2  ;;  %v555_v35 = vpop.f32.mrf.mxu3 }
  0xc0   : > { %v527_v36 = vadd.f32 %v526_v34, %v2559_v41  ;;  %v556_v37 = vadd.f32 %v555_v35, %v2567_v44 }
  0xc2   : > { %v625_v42 = vpop.f32.mrf.mxu0  ;;  %v654_v43 = vpop.f32.mrf.mxu1 }
  0xc3   : > { %v666_v45 = vadd.f32 %v625_v42, %v527_v36  ;;  %v667_v47 = vadd.f32 %v654_v43, %v556_v37 }
  0xc5   : > { %v680_v41 = vmul.f32 %v2723_v39, %v666_v45  ;;  %v681_v44 = vmul.f32 %v2725_v40, %v667_v47 }
  0xc7   : > { %v695_v49 = vadd.f32 %v2727_v46, %v680_v41  ;;  %v696_v50 = vadd.f32 %v2729_v48, %v681_v44  ;;  %v529_v51 = vpop.f32.mrf.mxu2  ;;  %v558_v52 = vpop.f32.mrf.mxu3 }
  0xc8   : > { %v530_v53 = vadd.f32 %v529_v51, %v2623_v63  ;;  %v559_v54 = vadd.f32 %v558_v52, %v2634_v3 }
  0xc9   : > { %v711_v55 = vmin.f32 %v695_v49, 0.0  ;;  %v712_v56 = vmin.f32 %v696_v50, 0.0  ;;  %vm703_vm2 = vcmp.gt.f32.partialorder %v695_v49, 0.0  ;;  %vm704_vm3 = vcmp.gt.f32.partialorder %v696_v50, 0.0 }
  0xca   : > { %v628_v57 = vpop.f32.mrf.mxu0  ;;  %v657_v58 = vpop.f32.mrf.mxu1 }
  0xcb   : > { %v719_v59 = vmul.f32 1.442695, %v711_v55  ;;  %v721_v60 = vmul.f32 1.442695, %v712_v56  ;;  %v668_v61 = vadd.f32 %v628_v57, %v530_v53  ;;  %v669_v62 = vadd.f32 %v657_v58, %v559_v54 }
  0xcd   : > { %2155 = vpow2.f32 %v719_v59  ;;  %v682_v0 = vmul.f32 %v2723_v39, %v668_v61  ;;  %v683_v1 = vmul.f32 %v2725_v40, %v669_v62 }
  0xce   : > { %2157 = vpow2.f32 %v721_v60 }
  0xcf   : > { %v2740_v2 = vadd.f32 %v2727_v46, %v682_v0  ;;  %v2743_v63 = vadd.f32 %v2729_v48, %v683_v1  ;;  %v532_v3 = vpop.f32.mrf.mxu2  ;;  %v561_v4 = vpop.f32.mrf.mxu3 }
  0xd0   : > { %v533_v5 = vadd.f32 %v532_v3, %v462_v23  ;;  %v562_v6 = vadd.f32 %v561_v4, %v491_v24 }
  0xd1   : > { %v713_v7 = vmin.f32 %v2740_v2, 0.0  ;;  %v714_v8 = vmin.f32 %v2743_v63, 0.0  ;;  %vm705_vm4 = vcmp.gt.f32.partialorder %v2740_v2, 0.0  ;;  %vm706_vm5 = vcmp.gt.f32.partialorder %v2743_v63, 0.0 }
  0xd2   : > { %v631_v9 = vpop.f32.mrf.mxu0  ;;  %v660_v10 = vpop.f32.mrf.mxu1 }
  0xd3   : > { %v2156_v11 = vpop.eup %2155  ;;  %v670_v12 = vadd.f32 %v631_v9, %v533_v5  ;;  %v671_v13 = vadd.f32 %v660_v10, %v562_v6  ;;  %v723_v14 = vmul.f32 1.442695, %v713_v7  ;;  %v725_v15 = vmul.f32 1.442695, %v714_v8 }
  0xd4   : > { %v2158_v18 = vpop.eup %2157  ;;  %v1975_v19 = vadd.f32 -1.0, %v2156_v11 }
  0xd5   : > { %v1976_v22 = vadd.f32 -1.0, %v2158_v18  ;;  %v684_v23 = vmul.f32 %v2723_v39, %v670_v12  ;;  %v685_v24 = vmul.f32 %v2725_v40, %v671_v13  ;;  %2159 = vpow2.f32 %v723_v14 }
  0xd6   : > { %v743_v25 = vmul.f32 1.6732632, %v1975_v19  ;;  %2161 = vpow2.f32 %v725_v15  ;;  %v2011_v19 = vld [vmem:[%s3744_s4 + $0x1e0] sm:$0xff] }
  0xd7   : > { %v699_v26 = vadd.f32 %v2727_v46, %v684_v23  ;;  %v700_v27 = vadd.f32 %v2729_v48, %v685_v24  ;;  %v535_v28 = vpop.f32.mrf.mxu2  ;;  %v564_v29 = vpop.f32.mrf.mxu3  ;;  %v744_v30 = vmul.f32 1.6732632, %v1976_v22  ;;  %1038 = vmatpush.msrb.mxu2 %v2011_v19  ;;  %v2010_v22 = vld [vmem:[%s3744_s4 + $0x1d8] sm:$0xff]  ;;  %v2007_v23 = vld [vmem:[%s3744_s4 + $0x1c0] sm:$0xff]  ;;  %v2008_v24 = vld [vmem:[%s3744_s4 + $0x1c8] sm:$0xff] }
  0xd8   : > { %v536_v31 = vadd.f32 %v535_v28, %v2672_v16  ;;  %v565_v32 = vadd.f32 %v564_v29, %v2674_v17  ;;  %v751_v33 = vsel %vm703_vm2, %v695_v49, %v743_v25  ;;  %1062 = vmatpush.msrb.mxu3 %v2010_v22  ;;  %v2005_v25 = vld [vmem:[%s3744_s4 + $0x1b0] sm:$0xff]  ;;  %v2004_v28 = vld [vmem:[%s3744_s4 + $0x1a8] sm:$0xff]  ;;  %v974_v22 = vld [vmem:[%s3744_s4 + $0x20] sm:$0xff] }
  0xd9   : > { %v715_v34 = vmin.f32 %v699_v26, 0.0  ;;  %v716_v35 = vmin.f32 %v700_v27, 0.0  ;;  %v759_v36 = vmul.f32 1.050701, %v751_v33  ;;  %v752_v37 = vsel %vm704_vm3, %v696_v50, %v744_v30  ;;  %1039 = vmatpush.msrb.mxu2 %v2009_v21  ;;  %v2001_v29 = vld [vmem:[%s3744_s4 + $0x190] sm:$0xff]  ;;  %v2002_v30 = vld [vmem:[%s3744_s4 + $0x198] sm:$0xff] }
  0xda   : > { %v634_v38 = vpop.f32.mrf.mxu0  ;;  %v663_v42 = vpop.f32.mrf.mxu1  ;;  %v760_v43 = vmul.f32 1.050701, %v752_v37  ;;  %vm707_vm6 = vcmp.gt.f32.partialorder %v699_v26, 0.0  ;;  %vm708_vm7 = vcmp.gt.f32.partialorder %v700_v27, 0.0  ;;  %1063 = vmatpush.msrb.mxu3 %v2008_v24  ;;  %v1000_v33 = vld [vmem:[%s3744_s4 + $0xf0] sm:$0xff]  ;;  %v998_v37 = vld [vmem:[%s3744_s4 + $0xe0] sm:$0xff] }
  0xdb   : > { %v2160_v45 = vpop.eup %2159  ;;  %v672_v47 = vadd.f32 %v634_v38, %v536_v31  ;;  %v673_v41 = vadd.f32 %v663_v42, %v565_v32  ;;  %847 = vmatmul.f32.vlgmr.msra.gmra.mxu2 %v759_v36  ;;  %905 = vmatmul.f32.vlgmr.msra.gmra.mxu0 %v759_v36  ;;  %v727_v44 = vmul.f32 1.442695, %v715_v34  ;;  %v729_v51 = vmul.f32 1.442695, %v716_v35  ;;  %v1999_v31 = vld [vmem:[%s3744_s4 + $0x180] sm:$0xff]  ;;  %v2000_v32 = vld [vmem:[%s3744_s4 + $0x188] sm:$0xff] }
  0xdc   : > { %v2162_v52 = vpop.eup %2161  ;;  %876 = vmatmul.f32.vlgmr.msra.gmra.mxu3 %v760_v43  ;;  %934 = vmatmul.f32.vlgmr.msra.gmra.mxu1 %v760_v43  ;;  %v1977_v16 = vadd.f32 -1.0, %v2160_v45  ;;  %v1001_v34 = vld [vmem:[%s3744_s4 + $0xf8] sm:$0xff]  ;;  %v1997_v35 = vld [vmem:[%s3744_s4 + $0x170] sm:$0xff]  ;;  %v999_v38 = vld [vmem:[%s3744_s4 + $0xe8] sm:$0xff] }
  0xdd   : > { %v686_v17 = vmul.f32 %v2723_v39, %v672_v47  ;;  %v687_v49 = vmul.f32 %v2725_v40, %v673_v41  ;;  %v1978_v53 = vadd.f32 -1.0, %v2162_v52  ;;  %2163 = vpow2.f32 %v727_v44  ;;  %1040 = vmatpush.msrb.mxu2 %v2007_v23  ;;  %1083 = vmatpush.msrb.mxu0 %v1000_v33  ;;  %v1998_v36 = vld [vmem:[%s3744_s4 + $0x178] sm:$0xff]  ;;  %v1995_v42 = vld [vmem:[%s3744_s4 + $0x160] sm:$0xff]  ;;  %v1996_v43 = vld [vmem:[%s3744_s4 + $0x168] sm:$0xff] }
  0xde   : > { %v745_v50 = vmul.f32 1.6732632, %v1977_v16  ;;  %2165 = vpow2.f32 %v729_v51  ;;  %1106 = vmatpush.msrb.mxu1 %v1001_v34  ;;  %v996_v45 = vld [vmem:[%s3744_s4 + $0xd0] sm:$0xff]  ;;  %v997_v47 = vld [vmem:[%s3744_s4 + $0xd8] sm:$0xff]  ;;  %v994_v51 = vld [vmem:[%s3744_s4 + $0xc0] sm:$0xff] }
  0xdf   : > { %v701_v54 = vadd.f32 %v2727_v46, %v686_v17  ;;  %v702_v55 = vadd.f32 %v2729_v48, %v687_v49  ;;  %v746_v56 = vmul.f32 1.6732632, %v1978_v53  ;;  %1041 = vmatpush.msrb.mxu2 %v2005_v25  ;;  %1084 = vmatpush.msrb.mxu0 %v998_v37  ;;  %v1993_v41 = vld [vmem:[%s3744_s4 + $0x150] sm:$0xff]  ;;  %v1994_v44 = vld [vmem:[%s3744_s4 + $0x158] sm:$0xff]  ;;  %v995_v52 = vld [vmem:[%s3744_s4 + $0xc8] sm:$0xff] }
  0xe0   : > { %v753_v57 = vsel %vm705_vm4, %v2740_v2, %v745_v50  ;;  %1107 = vmatpush.msrb.mxu1 %v999_v38  ;;  %v1991_v16 = vld [vmem:[%s3744_s4 + $0x140] sm:$0xff]  ;;  %v1992_v17 = vld [vmem:[%s3744_s4 + $0x148] sm:$0xff]  ;;  %v992_v49 = vld [vmem:[%s3744_s4 + $0xb0] sm:$0xff] }
  0xe1   : > { %v717_v58 = vmin.f32 %v701_v54, 0.0  ;;  %v718_v59 = vmin.f32 %v702_v55, 0.0  ;;  %v761_v39 = vmul.f32 1.050701, %v753_v57  ;;  %v754_v40 = vsel %vm706_vm5, %v2743_v63, %v746_v56  ;;  %1085 = vmatpush.msrb.mxu0 %v996_v45  ;;  %v993_v53 = vld [vmem:[%s3744_s4 + $0xb8] sm:$0xff]  ;;  %v1989_v50 = vld [vmem:[%s3744_s4 + $0x130] sm:$0xff] }
  0xe2   : > { %v762_v60 = vmul.f32 1.050701, %v754_v40  ;;  %vm709_vm8 = vcmp.gt.f32.partialorder %v701_v54, 0.0  ;;  %vm710_vm9 = vcmp.gt.f32.partialorder %v702_v55, 0.0  ;;  %1108 = vmatpush.msrb.mxu1 %v997_v47  ;;  %v991_v56 = vld [vmem:[%s3744_s4 + $0xa8] sm:$0xff]  ;;  %v1987_v57 = vld [vmem:[%s3744_s4 + $0x120] sm:$0xff] }
  0xe3   : > { %v2164_v61 = vpop.eup %2163  ;;  %850 = vmatmul.f32.gmra.mxu2 %v761_v39  ;;  %908 = vmatmul.f32.gmra.mxu0 %v761_v39  ;;  %v731_v62 = vmul.f32 1.442695, %v717_v58  ;;  %v733_v46 = vmul.f32 1.442695, %v718_v59  ;;  %v1988_v58 = vld [vmem:[%s3744_s4 + $0x128] sm:$0xff]  ;;  %v988_v59 = vld [vmem:[%s3744_s4 + $0x90] sm:$0xff] }
  0xe4   : > { %v2166_v0 = vpop.eup %2165  ;;  %879 = vmatmul.f32.gmra.mxu3 %v762_v60  ;;  %937 = vmatmul.f32.gmra.mxu1 %v762_v60  ;;  %v1979_v48 = vadd.f32 -1.0, %v2164_v61  ;;  %v989_v39 = vld [vmem:[%s3744_s4 + $0x98] sm:$0xff]  ;;  %v1985_v40 = vld [vmem:[%s3744_s4 + $0x110] sm:$0xff]  ;;  %v986_v61 = vld [vmem:[%s3744_s4 + $0x80] sm:$0xff] }
  0xe5   : > { %v1980_v1 = vadd.f32 -1.0, %v2166_v0  ;;  %2167 = vpow2.f32 %v731_v62  ;;  %1086 = vmatpush.msrb.mxu0 %v994_v51  ;;  %1109 = vmatpush.msrb.mxu1 %v995_v52  ;;  %v1986_v60 = vld [vmem:[%s3744_s4 + $0x118] sm:$0xff]  ;;  %v987_v62 = vld [vmem:[%s3744_s4 + $0x88] sm:$0xff]  ;;  %v2037_v19 = vld [vmem:[%s3744_s4 + $0x2b0] sm:$0xff] }
  0xe6   : > { %v747_v2 = vmul.f32 1.6732632, %v1979_v48  ;;  %2169 = vpow2.f32 %v733_v46  ;;  %v1983_v46 = vld [vmem:[%s3744_s4 + $0x100] sm:$0xff]  ;;  %v1984_v0 = vld [vmem:[%s3744_s4 + $0x108] sm:$0xff]  ;;  %v984_v48 = vld [vmem:[%s3744_s4 + $0x70] sm:$0xff] }
  0xe7   : > { %v748_v3 = vmul.f32 1.6732632, %v1980_v1  ;;  %1087 = vmatpush.msrb.mxu0 %v992_v49  ;;  %1110 = vmatpush.msrb.mxu1 %v993_v53  ;;  %v985_v1 = vld [vmem:[%s3744_s4 + $0x78] sm:$0xff]  ;;  %v975_v23 = vld [vmem:[%s3744_s4 + $0x28] sm:$0xff]  ;;  %v2035_v24 = vld [vmem:[%s3744_s4 + $0x2a0] sm:$0xff] }
  0xe8   : > { %v755_v4 = vsel %vm707_vm6, %v699_v26, %v747_v2  ;;  %v2006_v26 = vld [vmem:[%s3744_s4 + $0x1b8] sm:$0xff]  ;;  %v2045_v2 = vld [vmem:[%s3744_s4 + $0x2f0] sm:$0xff]  ;;  %v2031_v33 = vld [vmem:[%s3744_s4 + $0x280] sm:$0xff] }
  0xe9   : > { %v763_v5 = vmul.f32 1.050701, %v755_v4  ;;  %v756_v63 = vsel %vm708_vm7, %v700_v27, %v748_v3  ;;  %1064 = vmatpush.msrb.mxu3 %v2006_v26  ;;  %v2003_v27 = vld [vmem:[%s3744_s4 + $0x1a0] sm:$0xff]  ;;  %1111 = vmatpush.msrb.mxu1 %v991_v56  ;;  %v2046_v3 = vld [vmem:[%s3744_s4 + $0x2f8] sm:$0xff]  ;;  %v2036_v26 = vld [vmem:[%s3744_s4 + $0x2a8] sm:$0xff] }
  0xea   : > { %v764_v6 = vmul.f32 1.050701, %v756_v63  ;;  %1042 = vmatpush.msrb.mxu2 %v2003_v27  ;;  %v982_v4 = vld [vmem:[%s3744_s4 + $0x60] sm:$0xff]  ;;  %v972_v27 = vld [vmem:[%s3744_s4 + $0x10] sm:$0xff]  ;;  %v2032_v34 = vld [vmem:[%s3744_s4 + $0x288] sm:$0xff] }
  0xeb   : > { %v2168_v7 = vpop.eup %2167  ;;  %853 = vmatmul.f32.gmra.mxu2 %v763_v5  ;;  %911 = vmatmul.f32.gmra.mxu0 %v763_v5  ;;  %v983_v5 = vld [vmem:[%s3744_s4 + $0x68] sm:$0xff]  ;;  %v2043_v63 = vld [vmem:[%s3744_s4 + $0x2e0] sm:$0xff]  ;;  %v2030_v37 = vld [vmem:[%s3744_s4 + $0x278] sm:$0xff] }
  0xec   : > { %v2170_v8 = vpop.eup %2169  ;;  %882 = vmatmul.f32.gmra.mxu3 %v764_v6  ;;  %940 = vmatmul.f32.gmra.mxu1 %v764_v6  ;;  %v1981_v9 = vadd.f32 -1.0, %v2168_v7  ;;  %v2044_v6 = vld [vmem:[%s3744_s4 + $0x2e8] sm:$0xff]  ;;  %v980_v7 = vld [vmem:[%s3744_s4 + $0x50] sm:$0xff]  ;;  %v2026_v52 = vld [vmem:[%s3744_s4 + $0x258] sm:$0xff] }
  0xed   : > { %v1982_v10 = vadd.f32 -1.0, %v2170_v8  ;;  %1065 = vmatpush.msrb.mxu3 %v2004_v28  ;;  %1043 = vmatpush.msrb.mxu2 %v2001_v29  ;;  %v981_v8 = vld [vmem:[%s3744_s4 + $0x58] sm:$0xff]  ;;  %v2033_v29 = vld [vmem:[%s3744_s4 + $0x290] sm:$0xff]  ;;  %v2024_v49 = vld [vmem:[%s3744_s4 + $0x248] sm:$0xff] }
  0xee   : > { %v749_v11 = vmul.f32 1.6732632, %v1981_v9  ;;  %1112 = vmatpush.msrb.mxu1 %v989_v39  ;;  %v2041_v9 = vld [vmem:[%s3744_s4 + $0x2d0] sm:$0xff]  ;;  %v973_v28 = vld [vmem:[%s3744_s4 + $0x18] sm:$0xff] }
  0xef   : > { %v750_v12 = vmul.f32 1.6732632, %v1982_v10  ;;  %1066 = vmatpush.msrb.mxu3 %v2002_v30  ;;  %1044 = vmatpush.msrb.mxu2 %v1999_v31  ;;  %v2042_v10 = vld [vmem:[%s3744_s4 + $0x2d8] sm:$0xff]  ;;  %v970_v31 = vld [vmem:[%s3744_s4] sm:$0xff]  ;;  %v2025_v51 = vld [vmem:[%s3744_s4 + $0x250] sm:$0xff] }
  0xf0   : > { %v757_v13 = vsel %vm709_vm8, %v701_v54, %v749_v11  ;;  %v1990_v54 = vld [vmem:[%s3744_s4 + $0x138] sm:$0xff]  ;;  %1113 = vmatpush.msrb.mxu1 %v987_v62  ;;  %v978_v11 = vld [vmem:[%s3744_s4 + $0x40] sm:$0xff] }
  0xf1   : > { %v765_v14 = vmul.f32 1.050701, %v757_v13  ;;  %v758_v15 = vsel %vm710_vm9, %v702_v55, %v750_v12  ;;  %1067 = vmatpush.msrb.mxu3 %v2000_v32  ;;  %1045 = vmatpush.msrb.mxu2 %v1997_v35  ;;  %v990_v55 = vld [vmem:[%s3744_s4 + $0xa0] sm:$0xff]  ;;  %v979_v12 = vld [vmem:[%s3744_s4 + $0x48] sm:$0xff]  ;;  %v2034_v30 = vld [vmem:[%s3744_s4 + $0x298] sm:$0xff] }
  0xf2   : > { %v766_v18 = vmul.f32 1.050701, %v758_v15  ;;  %1088 = vmatpush.msrb.mxu0 %v990_v55  ;;  %1114 = vmatpush.msrb.mxu1 %v985_v1  ;;  %v2039_v13 = vld [vmem:[%s3744_s4 + $0x2c0] sm:$0xff]  ;;  %v976_v15 = vld [vmem:[%s3744_s4 + $0x30] sm:$0xff]  ;;  %v971_v32 = vld [vmem:[%s3744_s4 + $0x8] sm:$0xff] }
  0xf3   : > { %856 = vmatmul.f32.gmra.mxu2 %v765_v14  ;;  %914 = vmatmul.f32.gmra.mxu0 %v765_v14  ;;  %v2040_v14 = vld [vmem:[%s3744_s4 + $0x2c8] sm:$0xff] }
  0xf4   : > { %885 = vmatmul.f32.gmra.mxu3 %v766_v18  ;;  %943 = vmatmul.f32.gmra.mxu1 %v766_v18  ;;  %v977_v18 = vld [vmem:[%s3744_s4 + $0x38] sm:$0xff] }
  0xf5   : > { %1068 = vmatpush.msrb.mxu3 %v1998_v36  ;;  %1046 = vmatpush.msrb.mxu2 %v1995_v42  ;;  %v2029_v36 = vld [vmem:[%s3744_s4 + $0x270] sm:$0xff]  ;;  %v2027_v42 = vld [vmem:[%s3744_s4 + $0x260] sm:$0xff] }
  0xf6   : > { %1089 = vmatpush.msrb.mxu0 %v988_v59  ;;  %1115 = vmatpush.msrb.mxu1 %v983_v5  ;;  %v2020_v59 = vld [vmem:[%s3744_s4 + $0x228] sm:$0xff] }
  0xf7   : > { %1069 = vmatpush.msrb.mxu3 %v1996_v43  ;;  %1047 = vmatpush.msrb.mxu2 %v1993_v41  ;;  %v2028_v43 = vld [vmem:[%s3744_s4 + $0x268] sm:$0xff] }
  0xf8   : > { %1090 = vmatpush.msrb.mxu0 %v986_v61  ;;  %1116 = vmatpush.msrb.mxu1 %v981_v8 }
  0xf9   : > { %1070 = vmatpush.msrb.mxu3 %v1994_v44  ;;  %1048 = vmatpush.msrb.mxu2 %v1991_v16 }
  0xfa   : > { %1091 = vmatpush.msrb.mxu0 %v984_v48  ;;  %1117 = vmatpush.msrb.mxu1 %v979_v12 }
  0xfb   : > { %1071 = vmatpush.msrb.mxu3 %v1992_v17  ;;  %1049 = vmatpush.msrb.mxu2 %v1989_v50  ;;  %v2023_v17 = vld [vmem:[%s3744_s4 + $0x240] sm:$0xff]  ;;  %v2021_v50 = vld [vmem:[%s3744_s4 + $0x230] sm:$0xff] }
  0xfc   : > { %1092 = vmatpush.msrb.mxu0 %v982_v4  ;;  %1118 = vmatpush.msrb.mxu1 %v977_v18 }
  0xfd   : > { %1072 = vmatpush.msrb.mxu3 %v1990_v54  ;;  %1050 = vmatpush.msrb.mxu2 %v1987_v57  ;;  %v2022_v54 = vld [vmem:[%s3744_s4 + $0x238] sm:$0xff] }
  0xfe   : > { %1093 = vmatpush.msrb.mxu0 %v980_v7  ;;  %1119 = vmatpush.msrb.mxu1 %v975_v23  ;;  %v1297_v23 = vld [vmem:[%s3746_s6 + $0xf0] sm:$0xff] }
  0xff   : > { %1073 = vmatpush.msrb.mxu3 %v1988_v58  ;;  %1051 = vmatpush.msrb.mxu2 %v1985_v40  ;;  %v2019_v58 = vld [vmem:[%s3744_s4 + $0x220] sm:$0xff]  ;;  %v2017_v40 = vld [vmem:[%s3744_s4 + $0x210] sm:$0xff] }
 0x100   : > { %1094 = vmatpush.msrb.mxu0 %v978_v11  ;;  %1120 = vmatpush.msrb.mxu1 %v973_v28  ;;  %v1327_v28 = vld [vmem:[%s3746_s6 + $0x1e0] sm:$0xff] }
 0x101   : > { %1074 = vmatpush.msrb.mxu3 %v1986_v60  ;;  %1052 = vmatpush.msrb.mxu2 %v1983_v46  ;;  %v2018_v60 = vld [vmem:[%s3744_s4 + $0x218] sm:$0xff]  ;;  %v2015_v46 = vld [vmem:[%s3744_s4 + $0x200] sm:$0xff] }
 0x102   : > { %1095 = vmatpush.msrb.mxu0 %v976_v15  ;;  %1121 = vmatpush.msrb.mxu1 %v971_v32  ;;  %v1325_v32 = vld [vmem:[%s3746_s6 + $0x1d0] sm:$0xff] }
 0x103   : > { %1075 = vmatpush.msrb.mxu3 %v1984_v0  ;;  %1164 = vmatpush.msra.mxu2 %v2045_v2  ;;  %v2016_v0 = vld [vmem:[%s3744_s4 + $0x208] sm:$0xff] }
 0x104   : > { %1096 = vmatpush.msrb.mxu0 %v974_v22 }
 0x105   : > { %1187 = vmatpush.msra.mxu3 %v2046_v3  ;;  %1165 = vmatpush.msra.mxu2 %v2043_v63 }
 0x106   : > { %1097 = vmatpush.msrb.mxu0 %v972_v27  ;;  %v1295_v27 = vld [vmem:[%s3746_s6 + $0xe0] sm:$0xff] }
 0x107   : > { %1188 = vmatpush.msra.mxu3 %v2044_v6  ;;  %1166 = vmatpush.msra.mxu2 %v2041_v9 }
 0x108   : > { %1098 = vmatpush.msrb.mxu0 %v970_v31  ;;  %v1293_v31 = vld [vmem:[%s3746_s6 + $0xd0] sm:$0xff] }
 0x109   : > { %1189 = vmatpush.msra.mxu3 %v2042_v10  ;;  %1167 = vmatpush.msra.mxu2 %v2039_v13 }
 0x10a   : > { %1331 = vmatpush.msra.mxu0 %v1297_v23 }
 0x10b   : > { %1190 = vmatpush.msra.mxu3 %v2040_v14  ;;  %1168 = vmatpush.msra.mxu2 %v2037_v19 }
 0x10c   : > { %1332 = vmatpush.msra.mxu0 %v1295_v27 }
 0x10d   : > { %1191 = vmatpush.msra.mxu3 %v2038_v20  ;;  %1169 = vmatpush.msra.mxu2 %v2035_v24  ;;  %v1329_v24 = vld [vmem:[%s3746_s6 + $0x1f0] sm:$0xff] }
 0x10e   : > { %1354 = vmatpush.msra.mxu1 %v1329_v24  ;;  %1333 = vmatpush.msra.mxu0 %v1293_v31 }
 0x10f   : > { %1192 = vmatpush.msra.mxu3 %v2036_v26  ;;  %1170 = vmatpush.msra.mxu2 %v2033_v29  ;;  %v1330_v26 = vld [vmem:[%s3746_s6 + $0x1f8] sm:$0xff]  ;;  %v1296_v29 = vld [vmem:[%s3746_s6 + $0xe8] sm:$0xff] }
 0x110   : > { %1355 = vmatpush.msra.mxu1 %v1327_v28 }
 0x111   : > { %1193 = vmatpush.msra.mxu3 %v2034_v30  ;;  %1171 = vmatpush.msra.mxu2 %v2031_v33  ;;  %v1328_v30 = vld [vmem:[%s3746_s6 + $0x1e8] sm:$0xff]  ;;  %v1294_v33 = vld [vmem:[%s3746_s6 + $0xd8] sm:$0xff] }
 0x112   : > { %1356 = vmatpush.msra.mxu1 %v1325_v32 }
 0x113   : > { %1194 = vmatpush.msra.mxu3 %v2032_v34  ;;  %1172 = vmatpush.msra.mxu2 %v2029_v36  ;;  %v1326_v34 = vld [vmem:[%s3746_s6 + $0x1d8] sm:$0xff]  ;;  %v1323_v36 = vld [vmem:[%s3746_s6 + $0x1c0] sm:$0xff] }
 0x114   : > { %1357 = vmatpush.msra.mxu1 %v1323_v36 }
 0x115   : > { %1195 = vmatpush.msra.mxu3 %v2030_v37  ;;  %1173 = vmatpush.msra.mxu2 %v2027_v42  ;;  %v1292_v37 = vld [vmem:[%s3746_s6 + $0xc8] sm:$0xff]  ;;  %v1289_v42 = vld [vmem:[%s3746_s6 + $0xb0] sm:$0xff] }
 0x117   : > { %1196 = vmatpush.msra.mxu3 %v2028_v43  ;;  %1174 = vmatpush.msra.mxu2 %v2025_v51  ;;  %v1321_v43 = vld [vmem:[%s3746_s6 + $0x1b0] sm:$0xff]  ;;  %v1288_v51 = vld [vmem:[%s3746_s6 + $0xa8] sm:$0xff] }
 0x118   : > { %1358 = vmatpush.msra.mxu1 %v1321_v43 }
 0x119   : > { %1197 = vmatpush.msra.mxu3 %v2026_v52  ;;  %1175 = vmatpush.msra.mxu2 %v2023_v17  ;;  %v1320_v52 = vld [vmem:[%s3746_s6 + $0x1a8] sm:$0xff]  ;;  %v1317_v17 = vld [vmem:[%s3746_s6 + $0x190] sm:$0xff] }
 0x11b   : > { %1198 = vmatpush.msra.mxu3 %v2024_v49  ;;  %1176 = vmatpush.msra.mxu2 %v2021_v50  ;;  %v1286_v49 = vld [vmem:[%s3746_s6 + $0x98] sm:$0xff]  ;;  %v1283_v50 = vld [vmem:[%s3746_s6 + $0x80] sm:$0xff] }
 0x11d   : > { %1199 = vmatpush.msra.mxu3 %v2022_v54  ;;  %1177 = vmatpush.msra.mxu2 %v2019_v58  ;;  %v1315_v54 = vld [vmem:[%s3746_s6 + $0x180] sm:$0xff]  ;;  %v1313_v58 = vld [vmem:[%s3746_s6 + $0x170] sm:$0xff] }
 0x11f   : > { %1200 = vmatpush.msra.mxu3 %v2020_v59  ;;  %1178 = vmatpush.msra.mxu2 %v2017_v40  ;;  %v1282_v59 = vld [vmem:[%s3746_s6 + $0x78] sm:$0xff]  ;;  %v1279_v40 = vld [vmem:[%s3746_s6 + $0x60] sm:$0xff] }
 0x121   : > { %1201 = vmatpush.msra.mxu3 %v2018_v60  ;;  %1179 = vmatpush.msra.mxu2 %v2015_v46  ;;  %v1311_v60 = vld [vmem:[%s3746_s6 + $0x160] sm:$0xff]  ;;  %v1277_v46 = vld [vmem:[%s3746_s6 + $0x50] sm:$0xff] }
 0x123   : > { %1202 = vmatpush.msra.mxu3 %v2016_v0  ;;  %v1309_v0 = vld [vmem:[%s3746_s6 + $0x150] sm:$0xff] }
 0x158   : > { %v906_v21 = vpop.f32.mrf.mxu0 }
 0x159   : > { %v935_v25 = vpop.f32.mrf.mxu1 }
 0x15a   : > { %v936_v45 = vadd.f32 %v935_v25, %v906_v21  ;;  %v1298_v25 = vld [vmem:[%s3746_s6 + $0xf8] sm:$0xff] }
 0x15e   : > { %v848_v35 = vpop.f32.mrf.mxu2 }
 0x15f   : > { %v877_v38 = vpop.f32.mrf.mxu3 }
 0x160   : > { %v878_v47 = vadd.f32 %v877_v38, %v848_v35  ;;  %v909_v41 = vpop.f32.mrf.mxu0  ;;  %v1291_v35 = vld [vmem:[%s3746_s6 + $0xc0] sm:$0xff]  ;;  %v1324_v38 = vld [vmem:[%s3746_s6 + $0x1c8] sm:$0xff] }
 0x161   : > { %v938_v44 = vpop.f32.mrf.mxu1  ;;  %1334 = vmatpush.msra.mxu0 %v1291_v35 }
 0x162   : > { %v947_v16 = vmax.f32 %v878_v47, %v936_v45  ;;  %v939_v56 = vadd.f32 %v938_v44, %v909_v41  ;;  %v1290_v45 = vld [vmem:[%s3746_s6 + $0xb8] sm:$0xff]  ;;  %v1287_v41 = vld [vmem:[%s3746_s6 + $0xa0] sm:$0xff] }
 0x163   : > { %1335 = vmatpush.msra.mxu0 %v1289_v42  ;;  %v1322_v47 = vld [vmem:[%s3746_s6 + $0x1b8] sm:$0xff]  ;;  %v1319_v44 = vld [vmem:[%s3746_s6 + $0x1a0] sm:$0xff] }
 0x164   : > { %951 = vst [vmem:[#allocation3] sm:$0xff] %v947_v16  ;;  %1359 = vmatpush.msra.mxu1 %v1319_v44  ;;  %v1285_v16 = vld [vmem:[%s3746_s6 + $0x90] sm:$0xff] }
 0x165   : > { %1336 = vmatpush.msra.mxu0 %v1287_v41  ;;  %v2080_v41 = vld [vmem:[%s3747_s7 + $0x1e0] sm:$0xff] }
 0x166   : > { %v851_v53 = vpop.f32.mrf.mxu2  ;;  %1360 = vmatpush.msra.mxu1 %v1317_v17 }
 0x167   : > { %v880_v55 = vpop.f32.mrf.mxu3  ;;  %1337 = vmatpush.msra.mxu0 %v1285_v16 }
 0x168   : > { %v881_v57 = vadd.f32 %v880_v55, %v851_v53  ;;  %v912_v61 = vpop.f32.mrf.mxu0  ;;  %v1318_v53 = vld [vmem:[%s3746_s6 + $0x198] sm:$0xff]  ;;  %v1284_v55 = vld [vmem:[%s3746_s6 + $0x88] sm:$0xff]  ;;  %1361 = vmatpush.msra.mxu1 %v1315_v54 }
 0x169   : > { %v941_v62 = vpop.f32.mrf.mxu1  ;;  %1338 = vmatpush.msra.mxu0 %v1283_v50 }
 0x16a   : > { %v948_v39 = vmax.f32 %v881_v57, %v939_v56  ;;  %v942_v2 = vadd.f32 %v941_v62, %v912_v61  ;;  %v1316_v56 = vld [vmem:[%s3746_s6 + $0x188] sm:$0xff]  ;;  %v1281_v57 = vld [vmem:[%s3746_s6 + $0x70] sm:$0xff]  ;;  %1362 = vmatpush.msra.mxu1 %v1313_v58 }
 0x16b   : > { %1339 = vmatpush.msra.mxu0 %v1281_v57  ;;  %v1280_v61 = vld [vmem:[%s3746_s6 + $0x68] sm:$0xff] }
 0x16c   : > { %952 = vst [vmem:[#allocation3 + $0x8] sm:$0xff] %v948_v39  ;;  %v1314_v39 = vld [vmem:[%s3746_s6 + $0x178] sm:$0xff]  ;;  %1363 = vmatpush.msra.mxu1 %v1311_v60  ;;  %v1312_v62 = vld [vmem:[%s3746_s6 + $0x168] sm:$0xff] }
 0x16d   : > { %1340 = vmatpush.msra.mxu0 %v1279_v40 }
 0x16e   : > { %v854_v48 = vpop.f32.mrf.mxu2  ;;  %1364 = vmatpush.msra.mxu1 %v1309_v0 }
 0x16f   : > { %v883_v1 = vpop.f32.mrf.mxu3  ;;  %1341 = vmatpush.msra.mxu0 %v1277_v46 }
 0x170   : > { %v884_v3 = vadd.f32 %v883_v1, %v854_v48  ;;  %v915_v7 = vpop.f32.mrf.mxu0  ;;  %v1278_v48 = vld [vmem:[%s3746_s6 + $0x58] sm:$0xff] }
 0x171   : > { %v944_v8 = vpop.f32.mrf.mxu1 }
 0x172   : > { %v949_v4 = vmax.f32 %v884_v3, %v942_v2  ;;  %v945_v11 = vadd.f32 %v944_v8, %v915_v7  ;;  %v1310_v3 = vld [vmem:[%s3746_s6 + $0x158] sm:$0xff]  ;;  %v1273_v7 = vld [vmem:[%s3746_s6 + $0x30] sm:$0xff] }
 0x173   : > { %v955_v5 = vld [vmem:[#allocation3] ss:$2 sm:$0xff]  ;;  %v959_v63 = vld [vmem:[#allocation3 + $0x1] ss:$2 sm:$0xff] }
 0x174   : > { %953 = vst [vmem:[#allocation3 + $0x10] sm:$0xff] %v949_v4  ;;  %v962_v6 = vmax.f32 %v955_v5, %v959_v63  ;;  %v1275_v4 = vld [vmem:[%s3746_s6 + $0x40] sm:$0xff]  ;;  %v1276_v63 = vld [vmem:[%s3746_s6 + $0x48] sm:$0xff]  ;;  %v1305_v8 = vld [vmem:[%s3746_s6 + $0x130] sm:$0xff] }
 0x175   : > { %v1307_v5 = vld [vmem:[%s3746_s6 + $0x140] sm:$0xff]  ;;  %1342 = vmatpush.msra.mxu0 %v1275_v4 }
 0x176   : > { %v857_v9 = vpop.f32.mrf.mxu2  ;;  %966 = vst [vmem:[#allocation4 + $0x1] sm:$0xff] %v962_v6  ;;  %1053 = vmatmul.f32.vlgmr.msrb.gmra.mxu2 %v962_v6  ;;  %1076 = vmatmul.f32.vlgmr.msrb.gmra.mxu3 %v962_v6  ;;  %v1308_v6 = vld [vmem:[%s3746_s6 + $0x148] sm:$0xff] }
 0x177   : > { %v886_v10 = vpop.f32.mrf.mxu3  ;;  %1377 = vmatpush.msrb.mxu2 %v1298_v25  ;;  %1400 = vmatpush.msrb.mxu3 %v1330_v26  ;;  %v1268_v25 = vld [vmem:[%s3746_s6 + $0x8] sm:$0xff] }
 0x178   : > { %v887_v12 = vadd.f32 %v886_v10, %v857_v9  ;;  %1365 = vmatpush.msra.mxu1 %v1307_v5  ;;  %v1274_v9 = vld [vmem:[%s3746_s6 + $0x38] sm:$0xff]  ;;  %1343 = vmatpush.msra.mxu0 %v1273_v7  ;;  %v1300_v26 = vld [vmem:[%s3746_s6 + $0x108] sm:$0xff] }
 0x179   : > { %1378 = vmatpush.msrb.mxu2 %v1296_v29  ;;  %1401 = vmatpush.msrb.mxu3 %v1328_v30  ;;  %v1306_v10 = vld [vmem:[%s3746_s6 + $0x138] sm:$0xff]  ;;  %v1214_v29 = vld [vmem:[%s3745_s5] ss:$2 sm:$0x3] }
 0x17a   : > { %v950_v13 = vmax.f32 %v887_v12, %v945_v11  ;;  %1366 = vmatpush.msra.mxu1 %v1305_v8  ;;  %v1271_v11 = vld [vmem:[%s3746_s6 + $0x20] sm:$0xff] }
 0x17b   : > { %1379 = vmatpush.msrb.mxu2 %v1294_v33  ;;  %1402 = vmatpush.msrb.mxu3 %v1326_v34  ;;  %v1303_v12 = vld [vmem:[%s3746_s6 + $0x120] sm:$0xff]  ;;  %v1216_v33 = vperm.slane %v1214_v29, 0  ;;  %v1217_v34 = vperm.slane %v1214_v29, 1 }
 0x17c   : > { %954 = vst [vmem:[#allocation3 + $0x18] sm:$0xff] %v950_v13  ;;  %v1272_v13 = vld [vmem:[%s3746_s6 + $0x28] sm:$0xff]  ;;  %1344 = vmatpush.msra.mxu0 %v1271_v11  ;;  %1367 = vmatpush.msra.mxu1 %v1303_v12  ;;  %v2047_v30 = vld [vmem:[%s3745_s5 + $0x1] ss:$2 sm:$0x3] }
 0x17d   : > { %v968_v14 = vld [vmem:[#allocation4] sm:$0xff]  ;;  %1380 = vmatpush.msrb.mxu2 %v1292_v37  ;;  %1403 = vmatpush.msrb.mxu3 %v1324_v38  ;;  %v1227_v38 = vperm.slane %v2047_v30, 0  ;;  %v1228_v43 = vperm.slane %v2047_v30, 1 }
 0x17e   : > { %1099 = vmatmul.f32.vlgmr.msrb.gmra.mxu0 %v968_v14  ;;  %1122 = vmatmul.f32.vlgmr.msrb.gmra.mxu1 %v968_v14  ;;  %v1304_v14 = vld [vmem:[%s3746_s6 + $0x128] sm:$0xff] }
 0x17f   : > { %1381 = vmatpush.msrb.mxu2 %v1290_v45  ;;  %1404 = vmatpush.msrb.mxu3 %v1322_v47  ;;  %v2082_v45 = vld [vmem:[%s3747_s7 + $0x1f0] sm:$0xff]  ;;  %v2083_v47 = vld [vmem:[%s3747_s7 + $0x1f8] sm:$0xff] }
 0x181   : > { %1382 = vmatpush.msrb.mxu2 %v1288_v51  ;;  %1405 = vmatpush.msrb.mxu3 %v1320_v52  ;;  %v2081_v52 = vld [vmem:[%s3747_s7 + $0x1e8] sm:$0xff] }
 0x183   : > { %v957_v15 = vld [vmem:[#allocation3 + $0x10] ss:$2 sm:$0xff]  ;;  %v961_v18 = vld [vmem:[#allocation3 + $0x11] ss:$2 sm:$0xff]  ;;  %1383 = vmatpush.msrb.mxu2 %v1286_v49  ;;  %1406 = vmatpush.msrb.mxu3 %v1318_v53  ;;  %v2078_v49 = vld [vmem:[%s3747_s7 + $0x1d0] sm:$0xff] }
 0x184   : > { %v963_v19 = vmax.f32 %v957_v15, %v961_v18  ;;  %v1269_v15 = vld [vmem:[%s3746_s6 + $0x10] sm:$0xff]  ;;  %v2079_v53 = vld [vmem:[%s3747_s7 + $0x1d8] sm:$0xff] }
 0x185   : > { %1384 = vmatpush.msrb.mxu2 %v1284_v55  ;;  %1407 = vmatpush.msrb.mxu3 %v1316_v56  ;;  %v1301_v18 = vld [vmem:[%s3746_s6 + $0x110] sm:$0xff]  ;;  %v2076_v55 = vld [vmem:[%s3747_s7 + $0x1c0] sm:$0xff]  ;;  %v2077_v56 = vld [vmem:[%s3747_s7 + $0x1c8] sm:$0xff] }
 0x186   : > { %967 = vst [vmem:[#allocation4 + $0x9] sm:$0xff] %v963_v19  ;;  %1056 = vmatmul.f32.gmra.mxu2 %v963_v19  ;;  %1079 = vmatmul.f32.gmra.mxu3 %v963_v19  ;;  %v1270_v19 = vld [vmem:[%s3746_s6 + $0x18] sm:$0xff] }
 0x187   : > { %1385 = vmatpush.msrb.mxu2 %v1282_v59  ;;  %1408 = vmatpush.msrb.mxu3 %v1314_v39 }
 0x188   : > { %1345 = vmatpush.msra.mxu0 %v1269_v15  ;;  %1368 = vmatpush.msra.mxu1 %v1301_v18 }
 0x189   : > { %1386 = vmatpush.msrb.mxu2 %v1280_v61  ;;  %1409 = vmatpush.msrb.mxu3 %v1312_v62  ;;  %v2074_v61 = vld [vmem:[%s3747_s7 + $0x1b0] sm:$0xff]  ;;  %v2075_v62 = vld [vmem:[%s3747_s7 + $0x1b8] sm:$0xff] }
 0x18b   : > { %1387 = vmatpush.msrb.mxu2 %v1278_v48  ;;  %1410 = vmatpush.msrb.mxu3 %v1310_v3  ;;  %v2073_v3 = vld [vmem:[%s3747_s7 + $0x1a8] sm:$0xff] }
 0x18d   : > { %v969_v20 = vld [vmem:[#allocation4 + $0x8] sm:$0xff]  ;;  %1388 = vmatpush.msrb.mxu2 %v1276_v63  ;;  %1411 = vmatpush.msrb.mxu3 %v1308_v6  ;;  %v2071_v6 = vld [vmem:[%s3747_s7 + $0x198] sm:$0xff] }
 0x18e   : > { %v1129_v21 = vld [vmem:[#allocation4 + $0x2] sm:$0xff]  ;;  %1102 = vmatmul.f32.gmra.mxu0 %v969_v20  ;;  %1125 = vmatmul.f32.gmra.mxu1 %v969_v20  ;;  %v1130_v22 = vld [vmem:[#allocation4 + $0xa] sm:$0xff] }
 0x18f   : > { %1180 = vmatmul.f32.vlgmr.msra.gmra.mxu2 %v1129_v21  ;;  %1203 = vmatmul.f32.vlgmr.msra.gmra.mxu3 %v1129_v21  ;;  %v1302_v20 = vld [vmem:[%s3746_s6 + $0x118] sm:$0xff]  ;;  %v1267_v21 = vld [vmem:[%s3746_s6] sm:$0xff]  ;;  %v2070_v63 = vld [vmem:[%s3747_s7 + $0x190] sm:$0xff] }
 0x190   : > { %1389 = vmatpush.msrb.mxu2 %v1274_v9  ;;  %1412 = vmatpush.msrb.mxu3 %v1306_v10  ;;  %v2068_v9 = vld [vmem:[%s3747_s7 + $0x180] sm:$0xff]  ;;  %v2069_v10 = vld [vmem:[%s3747_s7 + $0x188] sm:$0xff] }
 0x191   : > { %1346 = vmatpush.msra.mxu0 %v1267_v21 }
 0x192   : > { %1390 = vmatpush.msrb.mxu2 %v1272_v13  ;;  %1413 = vmatpush.msrb.mxu3 %v1304_v14  ;;  %v2066_v13 = vld [vmem:[%s3747_s7 + $0x170] sm:$0xff]  ;;  %v2067_v14 = vld [vmem:[%s3747_s7 + $0x178] sm:$0xff] }
 0x193   : > { %1501 = vmatpush.msrb.mxu0 %v2082_v45  ;;  %v2062_v45 = vld [vmem:[%s3747_s7 + $0x150] sm:$0xff] }
 0x194   : > { %1391 = vmatpush.msrb.mxu2 %v1270_v19  ;;  %1414 = vmatpush.msrb.mxu3 %v1302_v20 }
 0x195   : > { %1502 = vmatpush.msrb.mxu0 %v2080_v41  ;;  %v2060_v41 = vld [vmem:[%s3747_s7 + $0x140] sm:$0xff] }
 0x196   : > { %1392 = vmatpush.msrb.mxu2 %v1268_v25  ;;  %1415 = vmatpush.msrb.mxu3 %v1300_v26 }
 0x197   : > { %1183 = vmatmul.f32.gmra.mxu2 %v1130_v22  ;;  %1206 = vmatmul.f32.gmra.mxu3 %v1130_v22  ;;  %v1299_v22 = vld [vmem:[%s3746_s6 + $0x100] sm:$0xff] }
 0x198   : > { %1369 = vmatpush.msra.mxu1 %v1299_v22  ;;  %1503 = vmatpush.msrb.mxu0 %v2078_v49  ;;  %v2054_v49 = vld [vmem:[%s3747_s7 + $0x110] sm:$0xff] }
 0x19a   : > { %1521 = vmatpush.msrb.mxu1 %v2083_v47  ;;  %1504 = vmatpush.msrb.mxu0 %v2076_v55  ;;  %v2063_v47 = vld [vmem:[%s3747_s7 + $0x158] sm:$0xff]  ;;  %v1465_v55 = vld [vmem:[%s3747_s7 + $0xf0] sm:$0xff] }
 0x19b   : > { %1541 = vmatpush.msra.mxu2 %v1465_v55  ;;  %v2084_v55 = vld [vmem:[%s3747_s7 + $0x200] sm:$0xff] }
 0x19c   : > { %1522 = vmatpush.msrb.mxu1 %v2081_v52  ;;  %1505 = vmatpush.msrb.mxu0 %v2074_v61  ;;  %v2059_v52 = vld [vmem:[%s3747_s7 + $0x138] sm:$0xff]  ;;  %v1461_v61 = vld [vmem:[%s3747_s7 + $0xd0] sm:$0xff] }
 0x19e   : > { %1523 = vmatpush.msrb.mxu1 %v2079_v53  ;;  %v2055_v53 = vld [vmem:[%s3747_s7 + $0x118] sm:$0xff] }
 0x1a0   : > { %1524 = vmatpush.msrb.mxu1 %v2077_v56  ;;  %v1466_v56 = vld [vmem:[%s3747_s7 + $0xf8] sm:$0xff] }
 0x1a1   : > { %1561 = vmatpush.msra.mxu3 %v1466_v56  ;;  %v2085_v56 = vld [vmem:[%s3747_s7 + $0x208] sm:$0xff] }
 0x1a2   : > { %1525 = vmatpush.msrb.mxu1 %v2075_v62  ;;  %v1462_v62 = vld [vmem:[%s3747_s7 + $0xd8] sm:$0xff] }
 0x1a4   : > { %1526 = vmatpush.msrb.mxu1 %v2073_v3  ;;  %v2109_v3 = vld [vmem:[%s3747_s7 + $0x2c8] sm:$0xff] }
 0x1a6   : > { %1527 = vmatpush.msrb.mxu1 %v2071_v6  ;;  %v2107_v6 = vld [vmem:[%s3747_s7 + $0x2b8] sm:$0xff] }
 0x1a8   : > { %1528 = vmatpush.msrb.mxu1 %v2069_v10  ;;  %v2105_v10 = vld [vmem:[%s3747_s7 + $0x2a8] sm:$0xff] }
 0x1aa   : > { %1529 = vmatpush.msrb.mxu1 %v2067_v14  ;;  %v2103_v14 = vld [vmem:[%s3747_s7 + $0x298] sm:$0xff] }
 0x1f9   : > { %v1054_v1 = vpop.f32.mrf.mxu2  ;;  %v1077_v2 = vpop.f32.mrf.mxu3 }
 0x1fb   : > { %v1100_v27 = vpop.f32.mrf.mxu0  ;;  %v1123_v28 = vpop.f32.mrf.mxu1 }
 0x1fc   : > { %v1101_v31 = vadd.f32 %v1100_v27, %v1054_v1  ;;  %v1124_v32 = vadd.f32 %v1123_v28, %v1077_v2  ;;  %v2072_v2 = vld [vmem:[%s3747_s7 + $0x1a0] sm:$0xff] }
 0x1fd   : > { %1506 = vmatpush.msrb.mxu0 %v2072_v2  ;;  %v2108_v2 = vld [vmem:[%s3747_s7 + $0x2c0] sm:$0xff] }
 0x1ff   : > { %1507 = vmatpush.msrb.mxu0 %v2070_v63  ;;  %v2106_v63 = vld [vmem:[%s3747_s7 + $0x2b0] sm:$0xff] }
 0x201   : > { %1508 = vmatpush.msrb.mxu0 %v2068_v9  ;;  %v2104_v9 = vld [vmem:[%s3747_s7 + $0x2a0] sm:$0xff] }
 0x203   : > { %1509 = vmatpush.msrb.mxu0 %v2066_v13  ;;  %v2102_v13 = vld [vmem:[%s3747_s7 + $0x290] sm:$0xff] }
 0x209   : > { %v1057_v23 = vpop.f32.mrf.mxu2  ;;  %v1080_v24 = vpop.f32.mrf.mxu3 }
 0x20b   : > { %v1103_v16 = vpop.f32.mrf.mxu0  ;;  %v1126_v17 = vpop.f32.mrf.mxu1 }
 0x20c   : > { %v1104_v57 = vadd.f32 %v1103_v16, %v1057_v23  ;;  %v1127_v58 = vadd.f32 %v1126_v17, %v1080_v24  ;;  %v2056_v16 = vld [vmem:[%s3747_s7 + $0x120] sm:$0xff]  ;;  %v2057_v17 = vld [vmem:[%s3747_s7 + $0x128] sm:$0xff] }
 0x212   : > { %v1181_v35 = vpop.f32.mrf.mxu2  ;;  %v1204_v36 = vpop.f32.mrf.mxu3 }
 0x213   : > { %v1210_v37 = vadd.f32 %v1181_v35, %v1101_v31  ;;  %v1211_v42 = vadd.f32 %v1204_v36, %v1124_v32 }
 0x215   : > { %v1220_v44 = vmul.f32 %v1216_v33, %v1210_v37  ;;  %v1221_v51 = vmul.f32 %v1217_v34, %v1211_v42  ;;  %v2064_v42 = vld [vmem:[%s3747_s7 + $0x160] sm:$0xff] }
 0x216   : > { %1510 = vmatpush.msrb.mxu0 %v2064_v42  ;;  %v2092_v42 = vld [vmem:[%s3747_s7 + $0x240] sm:$0xff] }
 0x217   : > { %v1231_v50 = vadd.f32 %v1227_v38, %v1220_v44  ;;  %v1232_v54 = vadd.f32 %v1228_v43, %v1221_v51  ;;  %v2061_v44 = vld [vmem:[%s3747_s7 + $0x148] sm:$0xff]  ;;  %v2058_v51 = vld [vmem:[%s3747_s7 + $0x130] sm:$0xff] }
 0x218   : > { %1511 = vmatpush.msrb.mxu0 %v2062_v45  ;;  %v2090_v45 = vld [vmem:[%s3747_s7 + $0x230] sm:$0xff] }
 0x219   : > { %v1239_v59 = vmin.f32 %v1231_v50, 0.0  ;;  %v1240_v39 = vmin.f32 %v1232_v54, 0.0  ;;  %vm1235_vm10 = vcmp.gt.f32.partialorder %v1231_v50, 0.0  ;;  %vm1236_vm11 = vcmp.gt.f32.partialorder %v1232_v54, 0.0 }
 0x21a   : > { %v1184_v40 = vpop.f32.mrf.mxu2  ;;  %v1207_v60 = vpop.f32.mrf.mxu3  ;;  %1512 = vmatpush.msrb.mxu0 %v2060_v41  ;;  %v1437_v41 = vld [vmem:[%s3747_s7 + $0x10] sm:$0xff] }
 0x21b   : > { %v1243_v46 = vmul.f32 1.442695, %v1239_v59  ;;  %v1245_v0 = vmul.f32 1.442695, %v1240_v39  ;;  %v1212_v48 = vadd.f32 %v1184_v40, %v1104_v57  ;;  %v1213_v1 = vadd.f32 %v1207_v60, %v1127_v58  ;;  %v2114_v57 = vld [vmem:[%s3747_s7 + $0x2f0] sm:$0xff]  ;;  %v2115_v58 = vld [vmem:[%s3747_s7 + $0x2f8] sm:$0xff] }
 0x21c   : > { %1513 = vmatpush.msrb.mxu0 %v2058_v51  ;;  %v1463_v59 = vld [vmem:[%s3747_s7 + $0xe0] sm:$0xff]  ;;  %v1464_v39 = vld [vmem:[%s3747_s7 + $0xe8] sm:$0xff] }
 0x21d   : > { %2171 = vpow2.f32 %v1243_v46  ;;  %v1222_v4 = vmul.f32 %v1216_v33, %v1212_v48  ;;  %v1223_v5 = vmul.f32 %v1217_v34, %v1213_v1  ;;  %v2112_v40 = vld [vmem:[%s3747_s7 + $0x2e0] sm:$0xff]  ;;  %1542 = vmatpush.msra.mxu2 %v1463_v59  ;;  %1562 = vmatpush.msra.mxu3 %v1464_v39  ;;  %v2113_v60 = vld [vmem:[%s3747_s7 + $0x2e8] sm:$0xff]  ;;  %v2110_v46 = vld [vmem:[%s3747_s7 + $0x2d0] sm:$0xff] }
 0x21e   : > { %2173 = vpow2.f32 %v1245_v0  ;;  %1514 = vmatpush.msrb.mxu0 %v2056_v16  ;;  %v2111_v0 = vld [vmem:[%s3747_s7 + $0x2d8] sm:$0xff]  ;;  %v1459_v48 = vld [vmem:[%s3747_s7 + $0xc0] sm:$0xff]  ;;  %v1460_v1 = vld [vmem:[%s3747_s7 + $0xc8] sm:$0xff] }
 0x21f   : > { %v1233_v7 = vadd.f32 %v1227_v38, %v1222_v4  ;;  %v1234_v8 = vadd.f32 %v1228_v43, %v1223_v5  ;;  %v2065_v43 = vld [vmem:[%s3747_s7 + $0x168] sm:$0xff]  ;;  %1543 = vmatpush.msra.mxu2 %v1461_v61  ;;  %1563 = vmatpush.msra.mxu3 %v1462_v62  ;;  %v1457_v4 = vld [vmem:[%s3747_s7 + $0xb0] sm:$0xff]  ;;  %v1458_v5 = vld [vmem:[%s3747_s7 + $0xb8] sm:$0xff] }
 0x220   : > { %1530 = vmatpush.msrb.mxu1 %v2065_v43  ;;  %1515 = vmatpush.msrb.mxu0 %v2054_v49  ;;  %v2093_v43 = vld [vmem:[%s3747_s7 + $0x248] sm:$0xff]  ;;  %v2088_v51 = vld [vmem:[%s3747_s7 + $0x220] sm:$0xff] }
 0x221   : > { %v1241_v11 = vmin.f32 %v1233_v7, 0.0  ;;  %v1242_v12 = vmin.f32 %v1234_v8, 0.0  ;;  %vm1237_vm12 = vcmp.gt.f32.partialorder %v1233_v7, 0.0  ;;  %vm1238_vm13 = vcmp.gt.f32.partialorder %v1234_v8, 0.0  ;;  %1544 = vmatpush.msra.mxu2 %v1459_v48  ;;  %1564 = vmatpush.msra.mxu3 %v1460_v1  ;;  %v1435_v16 = vld [vmem:[%s3747_s7] sm:$0xff] }
 0x222   : > { %1531 = vmatpush.msrb.mxu1 %v2063_v47  ;;  %v2091_v47 = vld [vmem:[%s3747_s7 + $0x238] sm:$0xff] }
 0x223   : > { %v2172_v15 = vpop.eup %2171  ;;  %v1247_v18 = vmul.f32 1.442695, %v1241_v11  ;;  %v1249_v19 = vmul.f32 1.442695, %v1242_v12  ;;  %1545 = vmatpush.msra.mxu2 %v1457_v4  ;;  %1565 = vmatpush.msra.mxu3 %v1458_v5  ;;  %v1453_v11 = vld [vmem:[%s3747_s7 + $0x90] sm:$0xff]  ;;  %v1454_v12 = vld [vmem:[%s3747_s7 + $0x98] sm:$0xff] }
 0x224   : > { %v2174_v20 = vpop.eup %2173  ;;  %v2048_v21 = vadd.f32 -1.0, %v2172_v15  ;;  %1532 = vmatpush.msrb.mxu1 %v2061_v44  ;;  %v1451_v15 = vld [vmem:[%s3747_s7 + $0x80] sm:$0xff]  ;;  %v1438_v44 = vld [vmem:[%s3747_s7 + $0x18] sm:$0xff] }
 0x225   : > { %v2049_v22 = vadd.f32 -1.0, %v2174_v20  ;;  %2175 = vpow2.f32 %v1247_v18  ;;  %v1452_v18 = vld [vmem:[%s3747_s7 + $0x88] sm:$0xff] }
 0x226   : > { %v1255_v23 = vmul.f32 1.6732632, %v2048_v21  ;;  %2177 = vpow2.f32 %v1249_v19  ;;  %1533 = vmatpush.msrb.mxu1 %v2059_v52  ;;  %v2100_v19 = vld [vmem:[%s3747_s7 + $0x280] sm:$0xff]  ;;  %v2101_v20 = vld [vmem:[%s3747_s7 + $0x288] sm:$0xff]  ;;  %v1449_v21 = vld [vmem:[%s3747_s7 + $0x70] sm:$0xff] }
 0x227   : > { %v1256_v24 = vmul.f32 1.6732632, %v2049_v22  ;;  %v1450_v22 = vld [vmem:[%s3747_s7 + $0x78] sm:$0xff]  ;;  %v2089_v52 = vld [vmem:[%s3747_s7 + $0x228] sm:$0xff] }
 0x228   : > { %v1259_v25 = vsel %vm1235_vm10, %v1231_v50, %v1255_v23  ;;  %1534 = vmatpush.msrb.mxu1 %v2057_v17  ;;  %v2052_v50 = vld [vmem:[%s3747_s7 + $0x100] sm:$0xff]  ;;  %v2098_v23 = vld [vmem:[%s3747_s7 + $0x270] sm:$0xff]  ;;  %v1436_v17 = vld [vmem:[%s3747_s7 + $0x8] sm:$0xff] }
 0x229   : > { %v1263_v26 = vmul.f32 1.050701, %v1259_v25  ;;  %v1260_v27 = vsel %vm1236_vm11, %v1232_v54, %v1256_v24  ;;  %v2053_v54 = vld [vmem:[%s3747_s7 + $0x108] sm:$0xff]  ;;  %1516 = vmatpush.msrb.mxu0 %v2052_v50  ;;  %v2099_v24 = vld [vmem:[%s3747_s7 + $0x278] sm:$0xff]  ;;  %v1447_v25 = vld [vmem:[%s3747_s7 + $0x60] sm:$0xff] }
 0x22a   : > { %v1264_v28 = vmul.f32 1.050701, %v1260_v27  ;;  %1535 = vmatpush.msrb.mxu1 %v2055_v53  ;;  %v2096_v27 = vld [vmem:[%s3747_s7 + $0x260] sm:$0xff]  ;;  %v2086_v50 = vld [vmem:[%s3747_s7 + $0x210] sm:$0xff] }
 0x22b   : > { %v2176_v29 = vpop.eup %2175  ;;  %1347 = vmatmul.f32.vlgmr.msra.gmra.mxu0 %v1263_v26  ;;  %1393 = vmatmul.f32.vlgmr.msrb.gmra.mxu2 %v1263_v26  ;;  %v1448_v26 = vld [vmem:[%s3747_s7 + $0x68] sm:$0xff] }
 0x22c   : > { %v2178_v30 = vpop.eup %2177  ;;  %1370 = vmatmul.f32.vlgmr.msra.gmra.mxu1 %v1264_v28  ;;  %1416 = vmatmul.f32.vlgmr.msrb.gmra.mxu3 %v1264_v28  ;;  %v2050_v31 = vadd.f32 -1.0, %v2176_v29  ;;  %v2097_v28 = vld [vmem:[%s3747_s7 + $0x268] sm:$0xff]  ;;  %v1445_v29 = vld [vmem:[%s3747_s7 + $0x50] sm:$0xff] }
 0x22d   : > { %v2051_v32 = vadd.f32 -1.0, %v2178_v30  ;;  %1536 = vmatpush.msrb.mxu1 %v2053_v54  ;;  %1615 = vmatpush.msra.mxu0 %v2114_v57  ;;  %v1446_v30 = vld [vmem:[%s3747_s7 + $0x58] sm:$0xff] }
 0x22e   : > { %v1257_v33 = vmul.f32 1.6732632, %v2050_v31  ;;  %v2094_v31 = vld [vmem:[%s3747_s7 + $0x250] sm:$0xff]  ;;  %v2087_v54 = vld [vmem:[%s3747_s7 + $0x218] sm:$0xff] }
 0x22f   : > { %v1258_v34 = vmul.f32 1.6732632, %v2051_v32  ;;  %1635 = vmatpush.msra.mxu1 %v2115_v58  ;;  %1616 = vmatpush.msra.mxu0 %v2112_v40  ;;  %v1443_v32 = vld [vmem:[%s3747_s7 + $0x40] sm:$0xff] }
 0x230   : > { %v1261_v35 = vsel %vm1237_vm12, %v1233_v7, %v1257_v33  ;;  %v1455_v7 = vld [vmem:[%s3747_s7 + $0xa0] sm:$0xff]  ;;  %v1444_v33 = vld [vmem:[%s3747_s7 + $0x48] sm:$0xff] }
 0x231   : > { %v1265_v36 = vmul.f32 1.050701, %v1261_v35  ;;  %v1262_v37 = vsel %vm1238_vm13, %v1234_v8, %v1258_v34  ;;  %1636 = vmatpush.msra.mxu1 %v2113_v60  ;;  %1617 = vmatpush.msra.mxu0 %v2110_v46  ;;  %v1456_v8 = vld [vmem:[%s3747_s7 + $0xa8] sm:$0xff]  ;;  %v1441_v34 = vld [vmem:[%s3747_s7 + $0x30] sm:$0xff]  ;;  %v1442_v35 = vld [vmem:[%s3747_s7 + $0x38] sm:$0xff] }
 0x232   : > { %v1266_v38 = vmul.f32 1.050701, %v1262_v37  ;;  %1546 = vmatpush.msra.mxu2 %v1455_v7  ;;  %1566 = vmatpush.msra.mxu3 %v1456_v8  ;;  %v1439_v37 = vld [vmem:[%s3747_s7 + $0x20] sm:$0xff]  ;;  %v1752_v7 = vld [vmem:[%s3749_s9 + $0x1f0] sm:$0xff]  ;;  %v1721_v8 = vld [vmem:[%s3749_s9 + $0xf8] sm:$0xff] }
 0x233   : > { %1350 = vmatmul.f32.gmra.mxu0 %v1265_v36  ;;  %1396 = vmatmul.f32.gmra.mxu2 %v1265_v36  ;;  %v2095_v36 = vld [vmem:[%s3747_s7 + $0x258] sm:$0xff] }
 0x234   : > { %1373 = vmatmul.f32.gmra.mxu1 %v1266_v38  ;;  %1419 = vmatmul.f32.gmra.mxu3 %v1266_v38  ;;  %v1440_v38 = vld [vmem:[%s3747_s7 + $0x28] sm:$0xff] }
 0x235   : > { %1637 = vmatpush.msra.mxu1 %v2111_v0  ;;  %1618 = vmatpush.msra.mxu0 %v2108_v2 }
 0x236   : > { %1547 = vmatpush.msra.mxu2 %v1453_v11  ;;  %1567 = vmatpush.msra.mxu3 %v1454_v12  ;;  %v1750_v11 = vld [vmem:[%s3749_s9 + $0x1e0] sm:$0xff]  ;;  %v1719_v12 = vld [vmem:[%s3749_s9 + $0xe8] sm:$0xff] }
 0x237   : > { %1638 = vmatpush.msra.mxu1 %v2109_v3  ;;  %1619 = vmatpush.msra.mxu0 %v2106_v63 }
 0x238   : > { %1548 = vmatpush.msra.mxu2 %v1451_v15  ;;  %1568 = vmatpush.msra.mxu3 %v1452_v18  ;;  %v1748_v15 = vld [vmem:[%s3749_s9 + $0x1d0] sm:$0xff]  ;;  %v1717_v18 = vld [vmem:[%s3749_s9 + $0xd8] sm:$0xff] }
 0x239   : > { %1639 = vmatpush.msra.mxu1 %v2107_v6  ;;  %1620 = vmatpush.msra.mxu0 %v2104_v9  ;;  %v1720_v6 = vld [vmem:[%s3749_s9 + $0xf0] sm:$0xff]  ;;  %v1753_v9 = vld [vmem:[%s3749_s9 + $0x1f8] sm:$0xff] }
 0x23a   : > { %1549 = vmatpush.msra.mxu2 %v1449_v21  ;;  %1569 = vmatpush.msra.mxu3 %v1450_v22  ;;  %v1746_v21 = vld [vmem:[%s3749_s9 + $0x1c0] sm:$0xff]  ;;  %v1715_v22 = vld [vmem:[%s3749_s9 + $0xc8] sm:$0xff] }
 0x23b   : > { %1640 = vmatpush.msra.mxu1 %v2105_v10  ;;  %1621 = vmatpush.msra.mxu0 %v2102_v13  ;;  %v1718_v10 = vld [vmem:[%s3749_s9 + $0xe0] sm:$0xff]  ;;  %v1751_v13 = vld [vmem:[%s3749_s9 + $0x1e8] sm:$0xff] }
 0x23c   : > { %1550 = vmatpush.msra.mxu2 %v1447_v25  ;;  %1570 = vmatpush.msra.mxu3 %v1448_v26  ;;  %v1744_v25 = vld [vmem:[%s3749_s9 + $0x1b0] sm:$0xff]  ;;  %v1713_v26 = vld [vmem:[%s3749_s9 + $0xb8] sm:$0xff] }
 0x23d   : > { %1641 = vmatpush.msra.mxu1 %v2103_v14  ;;  %1622 = vmatpush.msra.mxu0 %v2100_v19  ;;  %v1716_v14 = vld [vmem:[%s3749_s9 + $0xd0] sm:$0xff]  ;;  %v1749_v19 = vld [vmem:[%s3749_s9 + $0x1d8] sm:$0xff] }
 0x23e   : > { %1551 = vmatpush.msra.mxu2 %v1445_v29  ;;  %1571 = vmatpush.msra.mxu3 %v1446_v30  ;;  %v1742_v29 = vld [vmem:[%s3749_s9 + $0x1a0] sm:$0xff]  ;;  %v1711_v30 = vld [vmem:[%s3749_s9 + $0xa8] sm:$0xff] }
 0x23f   : > { %1642 = vmatpush.msra.mxu1 %v2101_v20  ;;  %1623 = vmatpush.msra.mxu0 %v2098_v23  ;;  %v1714_v20 = vld [vmem:[%s3749_s9 + $0xc0] sm:$0xff]  ;;  %v1747_v23 = vld [vmem:[%s3749_s9 + $0x1c8] sm:$0xff] }
 0x240   : > { %1552 = vmatpush.msra.mxu2 %v1443_v32  ;;  %1572 = vmatpush.msra.mxu3 %v1444_v33  ;;  %v1708_v32 = vld [vmem:[%s3749_s9 + $0x90] sm:$0xff] }
 0x241   : > { %1643 = vmatpush.msra.mxu1 %v2099_v24  ;;  %1624 = vmatpush.msra.mxu0 %v2096_v27  ;;  %v1712_v24 = vld [vmem:[%s3749_s9 + $0xb0] sm:$0xff]  ;;  %v1745_v27 = vld [vmem:[%s3749_s9 + $0x1b8] sm:$0xff] }
 0x242   : > { %1553 = vmatpush.msra.mxu2 %v1441_v34  ;;  %1573 = vmatpush.msra.mxu3 %v1442_v35  ;;  %v1740_v33 = vld [vmem:[%s3749_s9 + $0x190] sm:$0xff]  ;;  %v1709_v34 = vld [vmem:[%s3749_s9 + $0x98] sm:$0xff] }
 0x243   : > { %1644 = vmatpush.msra.mxu1 %v2097_v28  ;;  %1625 = vmatpush.msra.mxu0 %v2094_v31  ;;  %v1710_v28 = vld [vmem:[%s3749_s9 + $0xa0] sm:$0xff]  ;;  %v1743_v31 = vld [vmem:[%s3749_s9 + $0x1a8] sm:$0xff]  ;;  %v1741_v35 = vld [vmem:[%s3749_s9 + $0x198] sm:$0xff] }
 0x244   : > { %1554 = vmatpush.msra.mxu2 %v1439_v37  ;;  %1574 = vmatpush.msra.mxu3 %v1440_v38  ;;  %v1738_v37 = vld [vmem:[%s3749_s9 + $0x180] sm:$0xff]  ;;  %v1707_v38 = vld [vmem:[%s3749_s9 + $0x88] sm:$0xff] }
 0x245   : > { %1645 = vmatpush.msra.mxu1 %v2095_v36  ;;  %1626 = vmatpush.msra.mxu0 %v2092_v42  ;;  %v1706_v36 = vld [vmem:[%s3749_s9 + $0x80] sm:$0xff]  ;;  %v1739_v42 = vld [vmem:[%s3749_s9 + $0x188] sm:$0xff] }
 0x246   : > { %1555 = vmatpush.msra.mxu2 %v1437_v41  ;;  %1575 = vmatpush.msra.mxu3 %v1438_v44  ;;  %v1737_v41 = vld [vmem:[%s3749_s9 + $0x178] sm:$0xff]  ;;  %v1702_v44 = vld [vmem:[%s3749_s9 + $0x60] sm:$0xff] }
 0x247   : > { %1646 = vmatpush.msra.mxu1 %v2093_v43  ;;  %1627 = vmatpush.msra.mxu0 %v2090_v45  ;;  %v1704_v43 = vld [vmem:[%s3749_s9 + $0x70] sm:$0xff] }
 0x248   : > { %1556 = vmatpush.msra.mxu2 %v1435_v16  ;;  %1576 = vmatpush.msra.mxu3 %v1436_v17  ;;  %v1736_v45 = vld [vmem:[%s3749_s9 + $0x170] sm:$0xff]  ;;  %v1735_v16 = vld [vmem:[%s3749_s9 + $0x168] sm:$0xff] }
 0x249   : > { %1647 = vmatpush.msra.mxu1 %v2091_v47  ;;  %1628 = vmatpush.msra.mxu0 %v2088_v51  ;;  %v1705_v47 = vld [vmem:[%s3749_s9 + $0x78] sm:$0xff]  ;;  %v1734_v51 = vld [vmem:[%s3749_s9 + $0x160] sm:$0xff]  ;;  %v1700_v17 = vld [vmem:[%s3749_s9 + $0x50] sm:$0xff] }
 0x24a   : > { %1754 = vmatpush.msrb.mxu2 %v1720_v6  ;;  %1774 = vmatpush.msrb.mxu3 %v1752_v7  ;;  %v1691_v6 = vld [vmem:[%s3749_s9 + $0x8] sm:$0xff] }
 0x24b   : > { %1648 = vmatpush.msra.mxu1 %v2089_v52  ;;  %1629 = vmatpush.msra.mxu0 %v2086_v50  ;;  %v1703_v52 = vld [vmem:[%s3749_s9 + $0x68] sm:$0xff]  ;;  %v1733_v50 = vld [vmem:[%s3749_s9 + $0x158] sm:$0xff] }
 0x24c   : > { %1755 = vmatpush.msrb.mxu2 %v1718_v10  ;;  %1775 = vmatpush.msrb.mxu3 %v1750_v11  ;;  %v1723_v7 = vld [vmem:[%s3749_s9 + $0x108] sm:$0xff]  ;;  %v2116_v11 = vld [vmem:[%s3748_s8 + $0x1] ss:$2 sm:$0x3] }
 0x24d   : > { %1649 = vmatpush.msra.mxu1 %v2087_v54  ;;  %1630 = vmatpush.msra.mxu0 %v2084_v55  ;;  %v1698_v54 = vld [vmem:[%s3749_s9 + $0x40] sm:$0xff] }
 0x24e   : > { %1756 = vmatpush.msrb.mxu2 %v1716_v14  ;;  %1776 = vmatpush.msrb.mxu3 %v1748_v15  ;;  %v1730_v55 = vld [vmem:[%s3749_s9 + $0x140] sm:$0xff] }
 0x24f   : > { %1650 = vmatpush.msra.mxu1 %v2085_v56  ;;  %v1699_v56 = vld [vmem:[%s3749_s9 + $0x48] sm:$0xff] }
 0x250   : > { %1757 = vmatpush.msrb.mxu2 %v1714_v20  ;;  %1777 = vmatpush.msrb.mxu3 %v1746_v21  ;;  %v1668_v21 = vperm.slane %v2116_v11, 0 }
 0x252   : > { %1758 = vmatpush.msrb.mxu2 %v1712_v24  ;;  %1778 = vmatpush.msrb.mxu3 %v1744_v25 }
 0x254   : > { %1759 = vmatpush.msrb.mxu2 %v1710_v28  ;;  %1779 = vmatpush.msrb.mxu3 %v1742_v29 }
 0x256   : > { %1760 = vmatpush.msrb.mxu2 %v1708_v32  ;;  %1780 = vmatpush.msrb.mxu3 %v1740_v33 }
 0x258   : > { %1761 = vmatpush.msrb.mxu2 %v1706_v36  ;;  %1781 = vmatpush.msrb.mxu3 %v1738_v37 }
 0x25a   : > { %1762 = vmatpush.msrb.mxu2 %v1704_v43  ;;  %1782 = vmatpush.msrb.mxu3 %v1736_v45 }
 0x25c   : > { %1763 = vmatpush.msrb.mxu2 %v1702_v44  ;;  %1783 = vmatpush.msrb.mxu3 %v1734_v51 }
 0x25e   : > { %1764 = vmatpush.msrb.mxu2 %v1700_v17 }
 0x260   : > { %1765 = vmatpush.msrb.mxu2 %v1698_v54 }
 0x2a8   : > { %v1348_v49 = vpop.f32.mrf.mxu0 }
 0x2a9   : > { %v1371_v53 = vpop.f32.mrf.mxu1 }
 0x2aa   : > { %v1372_v59 = vadd.f32 %v1371_v53, %v1348_v49  ;;  %v1732_v49 = vld [vmem:[%s3749_s9 + $0x150] sm:$0xff]  ;;  %v1701_v53 = vld [vmem:[%s3749_s9 + $0x58] sm:$0xff] }
 0x2ab   : > { %1784 = vmatpush.msrb.mxu3 %v1732_v49 }
 0x2ad   : > { %1785 = vmatpush.msrb.mxu3 %v1730_v55 }
 0x2ae   : > { %v1394_v57 = vpop.f32.mrf.mxu2 }
 0x2af   : > { %v1417_v58 = vpop.f32.mrf.mxu3 }
 0x2b0   : > { %v1418_v39 = vadd.f32 %v1417_v58, %v1394_v57  ;;  %v1351_v60 = vpop.f32.mrf.mxu0  ;;  %v1731_v57 = vld [vmem:[%s3749_s9 + $0x148] sm:$0xff]  ;;  %v1696_v58 = vld [vmem:[%s3749_s9 + $0x30] sm:$0xff] }
 0x2b1   : > { %v1374_v61 = vpop.f32.mrf.mxu1  ;;  %1766 = vmatpush.msrb.mxu2 %v1696_v58 }
 0x2b2   : > { %v1423_v40 = vmax.f32 %v1372_v59, %v1418_v39  ;;  %v1375_v0 = vadd.f32 %v1374_v61, %v1351_v60  ;;  %v1728_v59 = vld [vmem:[%s3749_s9 + $0x130] sm:$0xff]  ;;  %v1697_v39 = vld [vmem:[%s3749_s9 + $0x38] sm:$0xff]  ;;  %v1694_v60 = vld [vmem:[%s3749_s9 + $0x20] sm:$0xff] }
 0x2b3   : > { %1786 = vmatpush.msrb.mxu3 %v1728_v59  ;;  %v1726_v61 = vld [vmem:[%s3749_s9 + $0x120] sm:$0xff]  ;;  %1767 = vmatpush.msrb.mxu2 %v1694_v60 }
 0x2b4   : > { %1425 = vst [vmem:[#allocation5] sm:$0xff] %v1423_v40  ;;  %v1729_v40 = vld [vmem:[%s3749_s9 + $0x138] sm:$0xff] }
 0x2b5   : > { %1787 = vmatpush.msrb.mxu3 %v1726_v61 }
 0x2b6   : > { %v1397_v62 = vpop.f32.mrf.mxu2 }
 0x2b7   : > { %v1420_v46 = vpop.f32.mrf.mxu3 }
 0x2b8   : > { %v1421_v48 = vadd.f32 %v1420_v46, %v1397_v62  ;;  %v1695_v62 = vld [vmem:[%s3749_s9 + $0x28] sm:$0xff] }
 0x2b9   : > { %v1727_v46 = vld [vmem:[%s3749_s9 + $0x128] sm:$0xff] }
 0x2ba   : > { %v1424_v1 = vmax.f32 %v1375_v0, %v1421_v48  ;;  %v1692_v0 = vld [vmem:[%s3749_s9 + $0x10] sm:$0xff] }
 0x2bb   : > { %v1724_v48 = vld [vmem:[%s3749_s9 + $0x110] sm:$0xff]  ;;  %1768 = vmatpush.msrb.mxu2 %v1692_v0 }
 0x2bc   : > { %1426 = vst [vmem:[#allocation5 + $0x8] sm:$0xff] %v1424_v1  ;;  %v1693_v1 = vld [vmem:[%s3749_s9 + $0x18] sm:$0xff]  ;;  %1788 = vmatpush.msrb.mxu3 %v1724_v48 }
 0x2c3   : > { %v1427_v2 = vld [vmem:[#allocation5] ss:$2 sm:$0xff]  ;;  %v1429_v3 = vld [vmem:[#allocation5 + $0x1] ss:$2 sm:$0xff] }
 0x2c4   : > { %v1430_v4 = vmax.f32 %v1427_v2, %v1429_v3  ;;  %v1725_v2 = vld [vmem:[%s3749_s9 + $0x118] sm:$0xff] }
 0x2c6   : > { %1433 = vst [vmem:[#allocation6 + $0x1] sm:$0xff] %v1430_v4  ;;  %1517 = vmatmul.f32.vlgmr.msrb.gmra.mxu0 %v1430_v4  ;;  %1537 = vmatmul.f32.vlgmr.msrb.gmra.mxu1 %v1430_v4 }
 0x2c7   : > { %1794 = vmatpush.msrb.mxu0 %v1721_v8  ;;  %1814 = vmatpush.msrb.mxu1 %v1753_v9  ;;  %v1657_v8 = vld [vmem:[%s3748_s8] ss:$2 sm:$0x3] }
 0x2c8   : > { %v1659_v14 = vperm.slane %v1657_v8, 0  ;;  %v1660_v15 = vperm.slane %v1657_v8, 1 }
 0x2c9   : > { %1795 = vmatpush.msrb.mxu0 %v1719_v12  ;;  %1815 = vmatpush.msrb.mxu1 %v1751_v13 }
 0x2cb   : > { %1796 = vmatpush.msrb.mxu0 %v1717_v18  ;;  %1816 = vmatpush.msrb.mxu1 %v1749_v19 }
 0x2cd   : > { %v1434_v5 = vld [vmem:[#allocation6] sm:$0xff]  ;;  %1797 = vmatpush.msrb.mxu0 %v1715_v22  ;;  %1817 = vmatpush.msrb.mxu1 %v1747_v23  ;;  %v1669_v23 = vperm.slane %v2116_v11, 1 }
 0x2ce   : > { %v1581_v63 = vld [vmem:[#allocation6 + $0x2] sm:$0xff]  ;;  %1557 = vmatmul.f32.vlgmr.msra.gmra.mxu2 %v1434_v5  ;;  %1577 = vmatmul.f32.vlgmr.msra.gmra.mxu3 %v1434_v5  ;;  %v1690_v5 = vld [vmem:[%s3749_s9] sm:$0xff] }
 0x2cf   : > { %1631 = vmatmul.f32.vlgmr.msra.gmra.mxu0 %v1581_v63  ;;  %1651 = vmatmul.f32.vlgmr.msra.gmra.mxu1 %v1581_v63  ;;  %v1722_v63 = vld [vmem:[%s3749_s9 + $0x100] sm:$0xff] }
 0x2d0   : > { %1798 = vmatpush.msrb.mxu0 %v1713_v26  ;;  %1818 = vmatpush.msrb.mxu1 %v1745_v27 }
 0x2d1   : > { %1769 = vmatpush.msrb.mxu2 %v1690_v5  ;;  %1789 = vmatpush.msrb.mxu3 %v1722_v63 }
 0x2d2   : > { %1799 = vmatpush.msrb.mxu0 %v1711_v30  ;;  %1819 = vmatpush.msrb.mxu1 %v1743_v31 }
 0x2d4   : > { %1800 = vmatpush.msrb.mxu0 %v1709_v34  ;;  %1820 = vmatpush.msrb.mxu1 %v1741_v35 }
 0x2d6   : > { %1801 = vmatpush.msrb.mxu0 %v1707_v38  ;;  %1821 = vmatpush.msrb.mxu1 %v1739_v42 }
 0x2d8   : > { %1802 = vmatpush.msrb.mxu0 %v1705_v47  ;;  %1822 = vmatpush.msrb.mxu1 %v1737_v41 }
 0x2da   : > { %1803 = vmatpush.msrb.mxu0 %v1703_v52  ;;  %1823 = vmatpush.msrb.mxu1 %v1735_v16 }
 0x2dc   : > { %1804 = vmatpush.msrb.mxu0 %v1701_v53  ;;  %1824 = vmatpush.msrb.mxu1 %v1733_v50 }
 0x2de   : > { %1805 = vmatpush.msrb.mxu0 %v1699_v56  ;;  %1825 = vmatpush.msrb.mxu1 %v1731_v57 }
 0x2e0   : > { %1806 = vmatpush.msrb.mxu0 %v1697_v39  ;;  %1826 = vmatpush.msrb.mxu1 %v1729_v40 }
 0x2e2   : > { %1807 = vmatpush.msrb.mxu0 %v1695_v62  ;;  %1827 = vmatpush.msrb.mxu1 %v1727_v46 }
 0x2e4   : > { %1808 = vmatpush.msrb.mxu0 %v1693_v1  ;;  %1828 = vmatpush.msrb.mxu1 %v1725_v2 }
 0x2e6   : > { %1809 = vmatpush.msrb.mxu0 %v1691_v6  ;;  %1829 = vmatpush.msrb.mxu1 %v1723_v7 }
 0x343   : > { %v1518_v3 = vpop.f32.mrf.mxu0  ;;  %v1538_v4 = vpop.f32.mrf.mxu1 }
 0x34c   : > { %v1632_v18 = vpop.f32.mrf.mxu0  ;;  %v1652_v19 = vpop.f32.mrf.mxu1 }
 0x351   : > { %v1558_v9 = vpop.f32.mrf.mxu2  ;;  %v1578_v10 = vpop.f32.mrf.mxu3 }
 0x352   : > { %v1559_v12 = vadd.f32 %v1558_v9, %v1518_v3  ;;  %v1579_v13 = vadd.f32 %v1578_v10, %v1538_v4 }
 0x354   : > { %v1655_v20 = vadd.f32 %v1632_v18, %v1559_v12  ;;  %v1656_v22 = vadd.f32 %v1652_v19, %v1579_v13 }
 0x356   : > { %v1663_v24 = vmul.f32 %v1659_v14, %v1655_v20  ;;  %v1664_v25 = vmul.f32 %v1660_v15, %v1656_v22 }
 0x358   : > { %v1672_v26 = vadd.f32 %v1668_v21, %v1663_v24  ;;  %v1673_v27 = vadd.f32 %v1669_v23, %v1664_v25 }
 0x35a   : > { %v1676_v28 = vmin.f32 %v1672_v26, 0.0  ;;  %v1677_v29 = vmin.f32 %v1673_v27, 0.0  ;;  %vm1674_vm14 = vcmp.gt.f32.partialorder %v1672_v26, 0.0  ;;  %vm1675_vm15 = vcmp.gt.f32.partialorder %v1673_v27, 0.0 }
 0x35c   : > { %v1678_v30 = vmul.f32 1.442695, %v1676_v28  ;;  %v1680_v31 = vmul.f32 1.442695, %v1677_v29 }
 0x35e   : > { %2179 = vpow2.f32 %v1678_v30 }
 0x35f   : > { %2181 = vpow2.f32 %v1680_v31 }
 0x364   : > { %v2180_v32 = vpop.eup %2179 }
 0x365   : > { %v2182_v33 = vpop.eup %2181  ;;  %v2117_v34 = vadd.f32 -1.0, %v2180_v32 }
 0x366   : > { %v2118_v35 = vadd.f32 -1.0, %v2182_v33 }
 0x367   : > { %v1684_v36 = vmul.f32 1.6732632, %v2117_v34 }
 0x368   : > { %v1685_v37 = vmul.f32 1.6732632, %v2118_v35 }
 0x369   : > { %v1686_v38 = vsel %vm1674_vm14, %v1672_v26, %v1684_v36 }
 0x36a   : > { %v1688_v42 = vmul.f32 1.050701, %v1686_v38  ;;  %v1687_v43 = vsel %vm1675_vm15, %v1673_v27, %v1685_v37 }
 0x36b   : > { %v1689_v45 = vmul.f32 1.050701, %v1687_v43 }
 0x36c   : > { %1770 = vmatmul.f32.vlgmr.msrb.gmra.mxu2 %v1688_v42  ;;  %1810 = vmatmul.f32.vlgmr.msrb.gmra.mxu0 %v1688_v42 }
 0x36d   : > { %1790 = vmatmul.f32.vlgmr.msrb.gmra.mxu3 %v1689_v45  ;;  %1830 = vmatmul.f32.vlgmr.msrb.gmra.mxu1 %v1689_v45 }
 0x3e9   : > { %v1811_v47 = vpop.f32.mrf.mxu0 }
 0x3ea   : > { %v1831_v41 = vpop.f32.mrf.mxu1 }
 0x3eb   : > { %v1832_v52 = vadd.f32 %v1831_v41, %v1811_v47 }
 0x3ef   : > { %v1771_v44 = vpop.f32.mrf.mxu2 }
 0x3f0   : > { %v1791_v51 = vpop.f32.mrf.mxu3 }
 0x3f1   : > { %v1792_v16 = vadd.f32 %v1791_v51, %v1771_v44 }
 0x3f3   : > { %v1834_v17 = vmax.f32 %v1792_v16, %v1832_v52 }
 0x3f5   : > { %1835 = vst [vmem:[#allocation7] sm:$0xff] %v1834_v17 }
 0x3fc   : > { %v1836_v49 = vld [vmem:[#allocation7] ss:$2 sm:$0xf]  ;;  %v1838_v53 = vld [vmem:[#allocation7 + $0x1] ss:$2 sm:$0xf] }
 0x3fd   : > { %v1839_v50 = vmax.f32 %v1836_v49, %v1838_v53 }
 0x3ff   : > { %1840 = vst [vmem:[%s357_s29] sm:$0xf] %v1839_v50 }
 0x400 PF: > { %s20_s13 = sadd.s32 1, %s2189_s13  }
 0x401   : > { %p17_p4 = scmp.ge.s32.totalorder %s20_s13, 4  }
 0x403   :  { %19 = sbr.rel (!%p17_p4) target bundleno = 1 (0x1), region = 104 }

</bundles_post_ra>
